<compile_context>
chip_gen: v5e
topology: v5e:2x2
jax: 0.10.0
libtpu: 0.0.40
codegen_flags: <defaults>
</compile_context>

<pallas_src>
import jax
import jax.numpy as jnp
from jax import lax
from jax.experimental import pallas as pl
from jax.experimental.pallas import tpu as pltpu


def _make_fused_kernel(H, W, C, tile_h, compute_dtype):
    """Fused ResnetBlock kernel for one (batch, H-tile) grid step."""
    f32 = jnp.float32

    def conv3x3_reflect_w(rows, wcat_ref, n_rows):
        """'Valid' 3x3 conv over `rows`, reflection-padded along W in-kernel.

        rows:     (n_rows + 2, W, C) activations (compute dtype); the H halo
                  (reflection already applied) is supplied by the caller.
        wcat_ref: (3, 3*C, C) ref with wcat[dy, dx*C + c, d] = w[dy, dx, c, d].
        Returns   (n_rows, W, C) float32.
        """
        # Reflection pad along W, built once per conv on the VMEM tile.
        xpadw = jnp.concatenate(
            [rows[:, 1:2, :], rows, rows[:, W - 2:W - 1, :]], axis=1)
        # Per-dy im2col: put the three dx taps on the lane axis -> K = 3*C.
        b = jnp.concatenate(
            [xpadw[:, 0:W, :], xpadw[:, 1:W + 1, :], xpadw[:, 2:W + 2, :]],
            axis=2)                                      # (n_rows+2, W, 3C)
        acc = jnp.zeros((n_rows, W, C), f32)
        for dy in range(3):                              # dy shift = cheap outer-dim slice
            acc = acc + jnp.einsum(
                "hwk,kd->hwd", b[dy:dy + n_rows], wcat_ref[dy],
                preferred_element_type=f32)
        return acc

    def kernel(x_ref, w1_ref, w2_ref, s1_ref, s2_ref, out_ref):
        # x_ref:   (H, W, C)       full image of this batch element
        # w*_ref:  (3, 3*C, C)     scale-folded conv weights (compute dtype)
        # s*_ref:  (1, C)          per-channel shifts (float32)
        # out_ref: (tile_h, W, C)  output tile
        t = pl.program_id(1)
        n_t = pl.num_programs(1)
        r0 = t * tile_h

        # Gather x rows [r0-2, r0+tile_h+2) with H reflection baked in:
        #   global row -1 -> x[1], row H -> x[H-2]; rows -2 / H+1 only feed
        #   h rows that are replaced below, so they are merely clamped.
        idx_m2 = jnp.clip(r0 - 2, 0, H - 1)
        idx_m1 = jnp.where(r0 == 0, 1, r0 - 1)
        idx_p0 = jnp.where(r0 + tile_h == H, H - 2,
                           jnp.minimum(r0 + tile_h, H - 1))
        idx_p1 = jnp.clip(r0 + tile_h + 1, 0, H - 1)
        xrows = jnp.concatenate([
            x_ref[pl.ds(idx_m2, 1), :, :],
            x_ref[pl.ds(idx_m1, 1), :, :],
            x_ref[pl.ds(r0, tile_h), :, :],
            x_ref[pl.ds(idx_p0, 1), :, :],
            x_ref[pl.ds(idx_p1, 1), :, :],
        ], axis=0)                                       # (tile_h+4, W, C)

        x_f32 = xrows.astype(f32)
        x_c = xrows.astype(compute_dtype)
        shift1 = s1_ref[...].reshape(1, 1, C)
        shift2 = s2_ref[...].reshape(1, 1, C)

        # conv1 + BN1 + ReLU over h rows [r0-1, r0+tile_h+1).
        h_ext = conv3x3_reflect_w(x_c, w1_ref, tile_h + 2) + shift1
        h_ext = jnp.maximum(h_ext, 0.0)

        # Reflection pad of h along H at the global image boundary:
        # h[-1] -> h[1] (first tile), h[H] -> h[H-2] (last tile).
        top = jnp.where(t == 0, h_ext[2:3], h_ext[0:1])
        bot = jnp.where(t == n_t - 1,
                        h_ext[tile_h - 1:tile_h],
                        h_ext[tile_h + 1:tile_h + 2])
        h_in = jnp.concatenate([top, h_ext[1:tile_h + 1], bot], axis=0)

        # conv2 + BN2 + residual.
        out = conv3x3_reflect_w(h_in.astype(compute_dtype), w2_ref, tile_h)
        out = out + shift2 + x_f32[2:tile_h + 2]
        out_ref[...] = out.astype(out_ref.dtype)

    return kernel


def _pick_tile_h(H):
    """Largest convenient H tile that still yields >= 2 grid steps."""
    for cand in (64, 32, 16, 8, 4, 2):
        if H % cand == 0 and H // cand >= 2:
            return cand
    return H


def resnet_block_forward_nhwc(x_nhwc, params, *, compute_dtype=jnp.float32,
                              tile_h=None):
    """Fused ResnetBlock forward on an NHWC tensor."""
    N, H, W, C = x_nhwc.shape
    eps = 1e-5

    # Fold conv bias + eval-mode BatchNorm into (weight scale, channel shift).
    scale1 = params["gamma1"] * lax.rsqrt(params["var1"] + eps)
    shift1 = params["beta1"] + (params["b1"] - params["mean1"]) * scale1
    scale2 = params["gamma2"] * lax.rsqrt(params["var2"] + eps)
    shift2 = params["beta2"] + (params["b2"] - params["mean2"]) * scale2

    # (3,3,C,C) * scale -> (3, 3*C, C) with K index = dx*C + c; cast once.
    w1 = (params["w1_hwio"] * scale1[None, None, None, :]
          ).reshape(3, 3 * C, C).astype(compute_dtype)
    w2 = (params["w2_hwio"] * scale2[None, None, None, :]
          ).reshape(3, 3 * C, C).astype(compute_dtype)
    s1 = shift1.astype(jnp.float32).reshape(1, C)
    s2 = shift2.astype(jnp.float32).reshape(1, C)

    if tile_h is None:
        tile_h = _pick_tile_h(H)
    assert H % tile_h == 0 and tile_h >= 2, (H, tile_h)

    kernel = _make_fused_kernel(H, W, C, tile_h, compute_dtype)

    return pl.pallas_call(
        kernel,
        out_shape=jax.ShapeDtypeStruct((N, H, W, C), x_nhwc.dtype),
        grid=(N, H // tile_h),
        in_specs=[
            pl.BlockSpec((None, H, W, C), lambda n, t: (n, 0, 0, 0)),
            pl.BlockSpec((3, 3 * C, C), lambda n, t: (0, 0, 0)),
            pl.BlockSpec((3, 3 * C, C), lambda n, t: (0, 0, 0)),
            pl.BlockSpec((1, C), lambda n, t: (0, 0)),
            pl.BlockSpec((1, C), lambda n, t: (0, 0)),
        ],
        out_specs=pl.BlockSpec((None, tile_h, W, C), lambda n, t: (n, t, 0, 0)),
        compiler_params=pltpu.CompilerParams(
            dimension_semantics=("parallel", "parallel"),
            vmem_limit_bytes=48 * 1024 * 1024,
        ),
    )(x_nhwc, w1, w2, s1, s2)


def resnet_block_forward(x_nchw, params, *, compute_dtype=jnp.float32):
    """PyTorch-layout (NCHW) wrapper.

    TODO(synk): the NCHW<->NHWC transposes are an extra HBM relayout; a
    channels-last pipeline should call resnet_block_forward_nhwc directly.
    """
    x_nhwc = jnp.transpose(x_nchw, (0, 2, 3, 1))
    out = resnet_block_forward_nhwc(x_nhwc, params,
                                    compute_dtype=compute_dtype)
    return jnp.transpose(out, (0, 3, 1, 2))


def resnet_block_reference(x_nchw, params):
    """Pure-JAX reference (mirrors PyTorch eval-mode semantics)."""
    eps = 1e-5

    def conv(x, w_oihw, b):
        xp = jnp.pad(x, ((0, 0), (0, 0), (1, 1), (1, 1)), mode="reflect")
        y = lax.conv_general_dilated(
            xp, w_oihw, (1, 1), "VALID",
            dimension_numbers=("NCHW", "OIHW", "NCHW"))
        return y + b[None, :, None, None]

    def bn(x, g, b, m, v):
        return (g[None, :, None, None] * (x - m[None, :, None, None])
                / jnp.sqrt(v[None, :, None, None] + eps)
                + b[None, :, None, None])

    w1_oihw = jnp.transpose(params["w1_hwio"], (3, 2, 0, 1))
    w2_oihw = jnp.transpose(params["w2_hwio"], (3, 2, 0, 1))
    h = jax.nn.relu(bn(conv(x_nchw, w1_oihw, params["b1"]),
                       params["gamma1"], params["beta1"],
                       params["mean1"], params["var1"]))
    h = bn(conv(h, w2_oihw, params["b2"]),
           params["gamma2"], params["beta2"],
           params["mean2"], params["var2"])
    return x_nchw + h


def init_params(key, dim):
    keys = jax.random.split(key, 10)
    return {
        "w1_hwio": 0.1 * jax.random.normal(keys[0], (3, 3, dim, dim), jnp.float32),
        "b1": 0.05 * jax.random.normal(keys[1], (dim,), jnp.float32),
        "gamma1": 1.0 + 0.1 * jax.random.normal(keys[2], (dim,), jnp.float32),
        "beta1": 0.05 * jax.random.normal(keys[3], (dim,), jnp.float32),
        "mean1": 0.02 * jax.random.normal(keys[4], (dim,), jnp.float32),
        "var1": 1.0 + 0.1 * jax.random.uniform(keys[5], (dim,), jnp.float32),
        "w2_hwio": 0.1 * jax.random.normal(keys[6], (3, 3, dim, dim), jnp.float32),
        "b2": 0.05 * jax.random.normal(keys[7], (dim,), jnp.float32),
        "gamma2": 1.0 + 0.1 * jax.random.normal(keys[8], (dim,), jnp.float32),
        "beta2": 0.05 * jax.random.normal(keys[9], (dim,), jnp.float32),
        "mean2": jnp.linspace(-0.1, 0.1, dim, dtype=jnp.float32),
        "var2": 1.0 + jnp.linspace(0.0, 0.2, dim, dtype=jnp.float32),
    }


if __name__ == "__main__":
    N, C, H, W = 2, 8, 16, 16     # small shapes consistent with the module
    key = jax.random.PRNGKey(0)
    k_x, k_p = jax.random.split(key)
    x = jax.random.normal(k_x, (N, C, H, W), jnp.float32)
    params = init_params(k_p, C)

    ref = jax.block_until_ready(resnet_block_reference(x, params))

    # float32 MXU operands: strict correctness check.
    out_f32 = jax.block_until_ready(
        resnet_block_forward(x, params, compute_dtype=jnp.float32))
    assert out_f32.shape == (N, C, H, W)
    assert jnp.allclose(out_f32, ref, atol=1e-4, rtol=1e-4), float(
        jnp.max(jnp.abs(out_f32 - ref)))

    # bfloat16 MXU operands (f32 accumulation): looser tolerance.
    out_bf16 = jax.block_until_ready(
        resnet_block_forward(x, params, compute_dtype=jnp.bfloat16))
    assert jnp.allclose(out_bf16, ref, atol=1e-1, rtol=1e-1), float(
        jnp.max(jnp.abs(out_bf16 - ref)))

    print("KERNEL_OK")
</pallas_src>

<mosaic_0001>
module attributes {stable_mosaic.version = 11 : i64} {
  func.func @kernel(%arg0: i32, %arg1: i32, %arg2: memref<1x16x16x8xf32, #tpu.memory_space<vmem>>, %arg3: memref<3x24x8xf32, #tpu.memory_space<vmem>>, %arg4: memref<3x24x8xf32, #tpu.memory_space<vmem>>, %arg5: memref<1x8xf32, #tpu.memory_space<vmem>>, %arg6: memref<1x8xf32, #tpu.memory_space<vmem>>, %arg7: memref<1x8x16x8xf32, #tpu.memory_space<vmem>>) attributes {dimension_semantics = [#tpu.dimension_semantics<parallel>, #tpu.dimension_semantics<parallel>], iteration_bounds = array<i64: 2, 2>, scalar_prefetch = 0 : i64, scratch_operands = 0 : i64, tpu.core_type = #tpu.core_type<tc>, window_params = [{transform_indices = @transform_0, window_bounds = array<i64: 1, 16, 16, 8>}, {pipeline_mode = #tpu.pipeline_mode<synchronous>, transform_indices = @transform_1, window_bounds = array<i64: 3, 24, 8>}, {pipeline_mode = #tpu.pipeline_mode<synchronous>, transform_indices = @transform_2, window_bounds = array<i64: 3, 24, 8>}, {pipeline_mode = #tpu.pipeline_mode<synchronous>, transform_indices = @transform_3, window_bounds = array<i64: 1, 8>}, {pipeline_mode = #tpu.pipeline_mode<synchronous>, transform_indices = @transform_4, window_bounds = array<i64: 1, 8>}, {transform_indices = @transform_5, window_bounds = array<i64: 1, 8, 16, 8>}]} {
    %c8_i32 = arith.constant 8 : i32
    %0 = arith.muli %arg1, %c8_i32 : i32
    %c2_i32 = arith.constant 2 : i32
    %1 = arith.subi %0, %c2_i32 : i32
    %c0_i32 = arith.constant 0 : i32
    %c15_i32 = arith.constant 15 : i32
    %2 = arith.maxsi %c0_i32, %1 : i32
    %3 = arith.minsi %c15_i32, %2 : i32
    %c0_i32_0 = arith.constant 0 : i32
    %4 = arith.cmpi eq, %0, %c0_i32_0 : i32
    %c1_i32 = arith.constant 1 : i32
    %5 = arith.subi %0, %c1_i32 : i32
    %c1_i32_1 = arith.constant 1 : i32
    %6 = arith.select %4, %c1_i32_1, %5 : i32
    %c8_i32_2 = arith.constant 8 : i32
    %7 = arith.addi %0, %c8_i32_2 : i32
    %c16_i32 = arith.constant 16 : i32
    %8 = arith.cmpi eq, %7, %c16_i32 : i32
    %c8_i32_3 = arith.constant 8 : i32
    %9 = arith.addi %0, %c8_i32_3 : i32
    %c15_i32_4 = arith.constant 15 : i32
    %10 = arith.minsi %9, %c15_i32_4 : i32
    %c14_i32 = arith.constant 14 : i32
    %11 = arith.select %8, %c14_i32, %10 : i32
    %c8_i32_5 = arith.constant 8 : i32
    %12 = arith.addi %0, %c8_i32_5 : i32
    %c1_i32_6 = arith.constant 1 : i32
    %13 = arith.addi %12, %c1_i32_6 : i32
    %c0_i32_7 = arith.constant 0 : i32
    %c15_i32_8 = arith.constant 15 : i32
    %14 = arith.maxsi %c0_i32_7, %13 : i32
    %15 = arith.minsi %c15_i32_8, %14 : i32
    %c0 = arith.constant 0 : index
    %16 = arith.index_cast %3 : i32 to index
    %c0_9 = arith.constant 0 : index
    %c0_10 = arith.constant 0 : index
    %17 = vector.load %arg2[%c0, %16, %c0_9, %c0_10] : memref<1x16x16x8xf32, #tpu.memory_space<vmem>>, vector<1x1x16x8xf32>
    %18 = vector.shape_cast %17 : vector<1x1x16x8xf32> to vector<1x16x8xf32>
    %c0_11 = arith.constant 0 : index
    %19 = arith.index_cast %6 : i32 to index
    %c0_12 = arith.constant 0 : index
    %c0_13 = arith.constant 0 : index
    %20 = vector.load %arg2[%c0_11, %19, %c0_12, %c0_13] : memref<1x16x16x8xf32, #tpu.memory_space<vmem>>, vector<1x1x16x8xf32>
    %21 = vector.shape_cast %20 : vector<1x1x16x8xf32> to vector<1x16x8xf32>
    %c0_14 = arith.constant 0 : index
    %22 = arith.index_cast %0 : i32 to index
    %c0_15 = arith.constant 0 : index
    %c0_16 = arith.constant 0 : index
    %23 = vector.load %arg2[%c0_14, %22, %c0_15, %c0_16] : memref<1x16x16x8xf32, #tpu.memory_space<vmem>>, vector<1x8x16x8xf32>
    %24 = vector.shape_cast %23 : vector<1x8x16x8xf32> to vector<8x16x8xf32>
    %c0_17 = arith.constant 0 : index
    %25 = arith.index_cast %11 : i32 to index
    %c0_18 = arith.constant 0 : index
    %c0_19 = arith.constant 0 : index
    %26 = vector.load %arg2[%c0_17, %25, %c0_18, %c0_19] : memref<1x16x16x8xf32, #tpu.memory_space<vmem>>, vector<1x1x16x8xf32>
    %27 = vector.shape_cast %26 : vector<1x1x16x8xf32> to vector<1x16x8xf32>
    %c0_20 = arith.constant 0 : index
    %28 = arith.index_cast %15 : i32 to index
    %c0_21 = arith.constant 0 : index
    %c0_22 = arith.constant 0 : index
    %29 = vector.load %arg2[%c0_20, %28, %c0_21, %c0_22] : memref<1x16x16x8xf32, #tpu.memory_space<vmem>>, vector<1x1x16x8xf32>
    %30 = vector.shape_cast %29 : vector<1x1x16x8xf32> to vector<1x16x8xf32>
    %31 = tpu.concatenate %18, %21, %24, %27, %30 in 0 : vector<1x16x8xf32>, vector<1x16x8xf32>, vector<8x16x8xf32>, vector<1x16x8xf32>, vector<1x16x8xf32> -> vector<12x16x8xf32>
    %c0_23 = arith.constant 0 : index
    %c0_24 = arith.constant 0 : index
    %32 = vector.load %arg5[%c0_23, %c0_24] : memref<1x8xf32, #tpu.memory_space<vmem>>, vector<1x8xf32>
    %33 = vector.shape_cast %32 : vector<1x8xf32> to vector<1x1x8xf32>
    %c0_25 = arith.constant 0 : index
    %c0_26 = arith.constant 0 : index
    %34 = vector.load %arg6[%c0_25, %c0_26] : memref<1x8xf32, #tpu.memory_space<vmem>>, vector<1x8xf32>
    %35 = vector.shape_cast %34 : vector<1x8xf32> to vector<1x1x8xf32>
    %36 = vector.extract_strided_slice %31 {offsets = [0, 1, 0], sizes = [12, 1, 8], strides = [1, 1, 1]} : vector<12x16x8xf32> to vector<12x1x8xf32>
    %37 = vector.extract_strided_slice %31 {offsets = [0, 14, 0], sizes = [12, 1, 8], strides = [1, 1, 1]} : vector<12x16x8xf32> to vector<12x1x8xf32>
    %38 = tpu.concatenate %36, %31, %37 in 1 : vector<12x1x8xf32>, vector<12x16x8xf32>, vector<12x1x8xf32> -> vector<12x18x8xf32>
    %39 = vector.extract_strided_slice %38 {offsets = [0, 0, 0], sizes = [12, 16, 8], strides = [1, 1, 1]} : vector<12x18x8xf32> to vector<12x16x8xf32>
    %40 = vector.extract_strided_slice %38 {offsets = [0, 1, 0], sizes = [12, 16, 8], strides = [1, 1, 1]} : vector<12x18x8xf32> to vector<12x16x8xf32>
    %41 = vector.extract_strided_slice %38 {offsets = [0, 2, 0], sizes = [12, 16, 8], strides = [1, 1, 1]} : vector<12x18x8xf32> to vector<12x16x8xf32>
    %42 = tpu.concatenate %39, %40, %41 in 2 : vector<12x16x8xf32>, vector<12x16x8xf32>, vector<12x16x8xf32> -> vector<12x16x24xf32>
    %cst = arith.constant 0.000000e+00 : f32
    %43 = vector.broadcast %cst : f32 to vector<10x16x8xf32>
    %44 = vector.extract_strided_slice %42 {offsets = [0, 0, 0], sizes = [10, 16, 24], strides = [1, 1, 1]} : vector<12x16x24xf32> to vector<10x16x24xf32>
    %c0_27 = arith.constant 0 : index
    %c0_28 = arith.constant 0 : index
    %c0_29 = arith.constant 0 : index
    %45 = vector.load %arg3[%c0_27, %c0_28, %c0_29] : memref<3x24x8xf32, #tpu.memory_space<vmem>>, vector<1x24x8xf32>
    %46 = vector.shape_cast %45 : vector<1x24x8xf32> to vector<24x8xf32>
    "tpu.trace_start"() <{level = 10 : i32, message = "hwk,kd->hwd"}> : () -> ()
    %cst_30 = arith.constant dense<0.000000e+00> : vector<10x16x8xf32>
    %47 = tpu.matmul %44, %46, %cst_30 {dimension_numbers = #tpu.dot_dimension_numbers<[2], [0], [0, 1], [1], [0, 0, 0, 1, 1, 1], [], []>} : vector<10x16x24xf32>, vector<24x8xf32>, vector<10x16x8xf32> -> vector<10x16x8xf32>
    "tpu.trace_stop"() : () -> ()
    %48 = arith.addf %43, %47 : vector<10x16x8xf32>
    %49 = vector.extract_strided_slice %42 {offsets = [1, 0, 0], sizes = [10, 16, 24], strides = [1, 1, 1]} : vector<12x16x24xf32> to vector<10x16x24xf32>
    %c1 = arith.constant 1 : index
    %c0_31 = arith.constant 0 : index
    %c0_32 = arith.constant 0 : index
    %50 = vector.load %arg3[%c1, %c0_31, %c0_32] : memref<3x24x8xf32, #tpu.memory_space<vmem>>, vector<1x24x8xf32>
    %51 = vector.shape_cast %50 : vector<1x24x8xf32> to vector<24x8xf32>
    "tpu.trace_start"() <{level = 10 : i32, message = "hwk,kd->hwd"}> : () -> ()
    %cst_33 = arith.constant dense<0.000000e+00> : vector<10x16x8xf32>
    %52 = tpu.matmul %49, %51, %cst_33 {dimension_numbers = #tpu.dot_dimension_numbers<[2], [0], [0, 1], [1], [0, 0, 0, 1, 1, 1], [], []>} : vector<10x16x24xf32>, vector<24x8xf32>, vector<10x16x8xf32> -> vector<10x16x8xf32>
    "tpu.trace_stop"() : () -> ()
    %53 = arith.addf %48, %52 : vector<10x16x8xf32>
    %54 = vector.extract_strided_slice %42 {offsets = [2, 0, 0], sizes = [10, 16, 24], strides = [1, 1, 1]} : vector<12x16x24xf32> to vector<10x16x24xf32>
    %c2 = arith.constant 2 : index
    %c0_34 = arith.constant 0 : index
    %c0_35 = arith.constant 0 : index
    %55 = vector.load %arg3[%c2, %c0_34, %c0_35] : memref<3x24x8xf32, #tpu.memory_space<vmem>>, vector<1x24x8xf32>
    %56 = vector.shape_cast %55 : vector<1x24x8xf32> to vector<24x8xf32>
    "tpu.trace_start"() <{level = 10 : i32, message = "hwk,kd->hwd"}> : () -> ()
    %cst_36 = arith.constant dense<0.000000e+00> : vector<10x16x8xf32>
    %57 = tpu.matmul %54, %56, %cst_36 {dimension_numbers = #tpu.dot_dimension_numbers<[2], [0], [0, 1], [1], [0, 0, 0, 1, 1, 1], [], []>} : vector<10x16x24xf32>, vector<24x8xf32>, vector<10x16x8xf32> -> vector<10x16x8xf32>
    "tpu.trace_stop"() : () -> ()
    %58 = arith.addf %53, %57 : vector<10x16x8xf32>
    %59 = vector.broadcast %33 : vector<1x1x8xf32> to vector<10x16x8xf32>
    %60 = arith.addf %58, %59 : vector<10x16x8xf32>
    %cst_37 = arith.constant 0.000000e+00 : f32
    %61 = vector.broadcast %cst_37 : f32 to vector<10x16x8xf32>
    %62 = arith.maximumf %60, %61 : vector<10x16x8xf32>
    %c0_i32_38 = arith.constant 0 : i32
    %63 = arith.cmpi eq, %arg1, %c0_i32_38 : i32
    %64 = vector.extract_strided_slice %62 {offsets = [2, 0, 0], sizes = [1, 16, 8], strides = [1, 1, 1]} : vector<10x16x8xf32> to vector<1x16x8xf32>
    %65 = vector.extract_strided_slice %62 {offsets = [0, 0, 0], sizes = [1, 16, 8], strides = [1, 1, 1]} : vector<10x16x8xf32> to vector<1x16x8xf32>
    %66 = arith.select %63, %64, %65 : vector<1x16x8xf32>
    %c1_i32_39 = arith.constant 1 : i32
    %67 = arith.cmpi eq, %arg1, %c1_i32_39 : i32
    %68 = vector.extract_strided_slice %62 {offsets = [7, 0, 0], sizes = [1, 16, 8], strides = [1, 1, 1]} : vector<10x16x8xf32> to vector<1x16x8xf32>
    %69 = vector.extract_strided_slice %62 {offsets = [9, 0, 0], sizes = [1, 16, 8], strides = [1, 1, 1]} : vector<10x16x8xf32> to vector<1x16x8xf32>
    %70 = arith.select %67, %68, %69 : vector<1x16x8xf32>
    %71 = vector.extract_strided_slice %62 {offsets = [1, 0, 0], sizes = [8, 16, 8], strides = [1, 1, 1]} : vector<10x16x8xf32> to vector<8x16x8xf32>
    %72 = tpu.concatenate %66, %71, %70 in 0 : vector<1x16x8xf32>, vector<8x16x8xf32>, vector<1x16x8xf32> -> vector<10x16x8xf32>
    %73 = vector.extract_strided_slice %72 {offsets = [0, 1, 0], sizes = [10, 1, 8], strides = [1, 1, 1]} : vector<10x16x8xf32> to vector<10x1x8xf32>
    %74 = vector.extract_strided_slice %72 {offsets = [0, 14, 0], sizes = [10, 1, 8], strides = [1, 1, 1]} : vector<10x16x8xf32> to vector<10x1x8xf32>
    %75 = tpu.concatenate %73, %72, %74 in 1 : vector<10x1x8xf32>, vector<10x16x8xf32>, vector<10x1x8xf32> -> vector<10x18x8xf32>
    %76 = vector.extract_strided_slice %75 {offsets = [0, 0, 0], sizes = [10, 16, 8], strides = [1, 1, 1]} : vector<10x18x8xf32> to vector<10x16x8xf32>
    %77 = vector.extract_strided_slice %75 {offsets = [0, 1, 0], sizes = [10, 16, 8], strides = [1, 1, 1]} : vector<10x18x8xf32> to vector<10x16x8xf32>
    %78 = vector.extract_strided_slice %75 {offsets = [0, 2, 0], sizes = [10, 16, 8], strides = [1, 1, 1]} : vector<10x18x8xf32> to vector<10x16x8xf32>
    %79 = tpu.concatenate %76, %77, %78 in 2 : vector<10x16x8xf32>, vector<10x16x8xf32>, vector<10x16x8xf32> -> vector<10x16x24xf32>
    %cst_40 = arith.constant 0.000000e+00 : f32
    %80 = vector.broadcast %cst_40 : f32 to vector<8x16x8xf32>
    %81 = vector.extract_strided_slice %79 {offsets = [0, 0, 0], sizes = [8, 16, 24], strides = [1, 1, 1]} : vector<10x16x24xf32> to vector<8x16x24xf32>
    %c0_41 = arith.constant 0 : index
    %c0_42 = arith.constant 0 : index
    %c0_43 = arith.constant 0 : index
    %82 = vector.load %arg4[%c0_41, %c0_42, %c0_43] : memref<3x24x8xf32, #tpu.memory_space<vmem>>, vector<1x24x8xf32>
    %83 = vector.shape_cast %82 : vector<1x24x8xf32> to vector<24x8xf32>
    "tpu.trace_start"() <{level = 10 : i32, message = "hwk,kd->hwd"}> : () -> ()
    %cst_44 = arith.constant dense<0.000000e+00> : vector<8x16x8xf32>
    %84 = tpu.matmul %81, %83, %cst_44 {dimension_numbers = #tpu.dot_dimension_numbers<[2], [0], [0, 1], [1], [0, 0, 0, 1, 1, 1], [], []>} : vector<8x16x24xf32>, vector<24x8xf32>, vector<8x16x8xf32> -> vector<8x16x8xf32>
    "tpu.trace_stop"() : () -> ()
    %85 = arith.addf %80, %84 : vector<8x16x8xf32>
    %86 = vector.extract_strided_slice %79 {offsets = [1, 0, 0], sizes = [8, 16, 24], strides = [1, 1, 1]} : vector<10x16x24xf32> to vector<8x16x24xf32>
    %c1_45 = arith.constant 1 : index
    %c0_46 = arith.constant 0 : index
    %c0_47 = arith.constant 0 : index
    %87 = vector.load %arg4[%c1_45, %c0_46, %c0_47] : memref<3x24x8xf32, #tpu.memory_space<vmem>>, vector<1x24x8xf32>
    %88 = vector.shape_cast %87 : vector<1x24x8xf32> to vector<24x8xf32>
    "tpu.trace_start"() <{level = 10 : i32, message = "hwk,kd->hwd"}> : () -> ()
    %cst_48 = arith.constant dense<0.000000e+00> : vector<8x16x8xf32>
    %89 = tpu.matmul %86, %88, %cst_48 {dimension_numbers = #tpu.dot_dimension_numbers<[2], [0], [0, 1], [1], [0, 0, 0, 1, 1, 1], [], []>} : vector<8x16x24xf32>, vector<24x8xf32>, vector<8x16x8xf32> -> vector<8x16x8xf32>
    "tpu.trace_stop"() : () -> ()
    %90 = arith.addf %85, %89 : vector<8x16x8xf32>
    %91 = vector.extract_strided_slice %79 {offsets = [2, 0, 0], sizes = [8, 16, 24], strides = [1, 1, 1]} : vector<10x16x24xf32> to vector<8x16x24xf32>
    %c2_49 = arith.constant 2 : index
    %c0_50 = arith.constant 0 : index
    %c0_51 = arith.constant 0 : index
    %92 = vector.load %arg4[%c2_49, %c0_50, %c0_51] : memref<3x24x8xf32, #tpu.memory_space<vmem>>, vector<1x24x8xf32>
    %93 = vector.shape_cast %92 : vector<1x24x8xf32> to vector<24x8xf32>
    "tpu.trace_start"() <{level = 10 : i32, message = "hwk,kd->hwd"}> : () -> ()
    %cst_52 = arith.constant dense<0.000000e+00> : vector<8x16x8xf32>
    %94 = tpu.matmul %91, %93, %cst_52 {dimension_numbers = #tpu.dot_dimension_numbers<[2], [0], [0, 1], [1], [0, 0, 0, 1, 1, 1], [], []>} : vector<8x16x24xf32>, vector<24x8xf32>, vector<8x16x8xf32> -> vector<8x16x8xf32>
    "tpu.trace_stop"() : () -> ()
    %95 = arith.addf %90, %94 : vector<8x16x8xf32>
    %96 = vector.broadcast %35 : vector<1x1x8xf32> to vector<8x16x8xf32>
    %97 = arith.addf %95, %96 : vector<8x16x8xf32>
    %98 = vector.extract_strided_slice %31 {offsets = [2, 0, 0], sizes = [8, 16, 8], strides = [1, 1, 1]} : vector<12x16x8xf32> to vector<8x16x8xf32>
    %99 = arith.addf %97, %98 : vector<8x16x8xf32>
    %c0_53 = arith.constant 0 : index
    %c0_54 = arith.constant 0 : index
    %c0_55 = arith.constant 0 : index
    %c0_56 = arith.constant 0 : index
    %100 = vector.load %arg7[%c0_53, %c0_54, %c0_55, %c0_56] : memref<1x8x16x8xf32, #tpu.memory_space<vmem>>, vector<1x8x16x8xf32>
    %101 = vector.shape_cast %100 : vector<1x8x16x8xf32> to vector<8x16x8xf32>
    %102 = vector.shape_cast %99 : vector<8x16x8xf32> to vector<1x8x16x8xf32>
    tpu.vector_store %arg7[%c0_53, %c0_54, %c0_55, %c0_56], %102 {strides = array<i32>} : memref<1x8x16x8xf32, #tpu.memory_space<vmem>>, vector<1x8x16x8xf32>,
    return
  }
  func.func @transform_0(%arg0: i32, %arg1: i32) -> (i32, i32, i32, i32) {
    %c0_i32 = arith.constant 0 : i32
    %c0_i32_0 = arith.constant 0 : i32
    %c0_i32_1 = arith.constant 0 : i32
    %c0_i32_2 = arith.constant 0 : i32
    return %arg0, %c0_i32, %c0_i32_0, %c0_i32_1 : i32, i32, i32, i32
  }
  func.func @transform_1(%arg0: i32, %arg1: i32) -> (i32, i32, i32) {
    %c0_i32 = arith.constant 0 : i32
    %c0_i32_0 = arith.constant 0 : i32
    %c0_i32_1 = arith.constant 0 : i32
    %c0_i32_2 = arith.constant 0 : i32
    return %c0_i32, %c0_i32_0, %c0_i32_1 : i32, i32, i32
  }
  func.func @transform_2(%arg0: i32, %arg1: i32) -> (i32, i32, i32) {
    %c0_i32 = arith.constant 0 : i32
    %c0_i32_0 = arith.constant 0 : i32
    %c0_i32_1 = arith.constant 0 : i32
    %c0_i32_2 = arith.constant 0 : i32
    return %c0_i32, %c0_i32_0, %c0_i32_1 : i32, i32, i32
  }
  func.func @transform_3(%arg0: i32, %arg1: i32) -> (i32, i32) {
    %c0_i32 = arith.constant 0 : i32
    %c0_i32_0 = arith.constant 0 : i32
    %c0_i32_1 = arith.constant 0 : i32
    return %c0_i32, %c0_i32_0 : i32, i32
  }
  func.func @transform_4(%arg0: i32, %arg1: i32) -> (i32, i32) {
    %c0_i32 = arith.constant 0 : i32
    %c0_i32_0 = arith.constant 0 : i32
    %c0_i32_1 = arith.constant 0 : i32
    return %c0_i32, %c0_i32_0 : i32, i32
  }
  func.func @transform_5(%arg0: i32, %arg1: i32) -> (i32, i32, i32, i32) {
    %c0_i32 = arith.constant 0 : i32
    %c0_i32_0 = arith.constant 0 : i32
    %c0_i32_1 = arith.constant 0 : i32
    return %arg0, %arg1, %c0_i32, %c0_i32_0 : i32, i32, i32, i32
  }
}

</mosaic_0001>

<bundles_post_ra>
// kernel: tpu_custom_call.1
= control target key start
LH: loop header
LB: loop body
LE: loop exit
PB: predicated region body
PF: predicated region fallthrough
CT: control target
= control target key end

     0   :  { %s2355_s18 = smov 0   ;;  %s2357_s19 = smov 0   ;;  %s3526_s0 = inlined_call_operand.vmem [shape: f32[2,16,16,8], index: 0, kind: input, shape index: {}]   ;;  %s3527_s1 = inlined_call_operand.vmem [shape: f32[3,24,8], index: 1, kind: input, shape index: {}]   ;;  %s3528_s2 = inlined_call_operand.vmem [shape: f32[3,24,8], index: 2, kind: input, shape index: {}]   ;;  %s3529_s3 = inlined_call_operand.vmem [shape: f32[1,8], index: 3, kind: input, shape index: {}]   ;;  %s3530_s4 = inlined_call_operand.vmem [shape: f32[1,8], index: 4, kind: input, shape index: {}]   ;;  %s3531_s5 = inlined_call_operand.vmem [shape: f32[2,16,16,8], index: 5, kind: output, shape index: {}]  }
   0x1   :  { %s2359_s20 = smov 0   ;;  %s2361_s21 = smov 0  }
   0x2   :  { %s2363_s22 = smov 0  }
   0x3 LB: > { %s24_s23 = sadd.s32 1, %s2313_s20  ;;  %s27_s24 = sadd.s32 1, %s2317_s21  ;;  %s2321_s22 = sphi %s2363_s22, %s15_s22   ;;  %s2317_s21 = sphi %s2361_s21, %s3537_s21   ;;  %s2313_s20 = sphi %s2359_s20, %s3536_s20   ;;  %s2309_s19 = sphi %s2357_s19, %s3535_s19   ;;  %s2305_s18 = sphi %s2355_s18, %s3534_s18  }
   0x4   : > { %p25_p0 = scmp.ge.s32.totalorder %s24_s23, 2  ;;  %p2061_p1 = scmp.ge.s32.totalorder %s2321_s22, 1 }
   0x5   : > { %p201_p2 = scmp.lt.s32.totalorder %s2321_s22, 5 }
   0x6   : > { %s3539_s23 = smov (%p25_p0, %s24_s23), 0  ;;  %s3541_s24 = smov (!%p25_p0, %s27_s24), %s2317_s21 }
   0x7   : > { %p202_p3 = pnand %p2061_p1, %p201_p2  ;;  %p29_p4 = scmp.ge.s32.totalorder %s3541_s24, 2 }
   0x8   : > { %p234_p5 = scmp.lt.s32.totalorder (!%p202_p3), %s2309_s19, 1  ;;  %s2213_s25 = sshll.u32 (!%p202_p3), %s2305_s18, 7 }
   0x9   : > { %s3543_s24 = smov (%p29_p4, %s3541_s24), 0  ;;  %205 = sbr.rel (%p202_p3) target bundleno = 961 (0x3c1), region = 40 }
   0xa   : > { %s2391_s26 = sshll.u32 (!%p202_p3), %s2305_s18, 3  ;;  %s2323_s9 = smov (!%p202_p3), 8  }
   0xb   : > { %s259_s28 = sadd.s32 (!%p202_p3), 8, %s2391_s26  ;;  %s2324_s12 = smov (!%p202_p3), 16  }
   0xc   : > { %p261_p6 = scmp.lt.s32.totalorder (!%p202_p3), %s259_s28, 15  ;;  %p260_p7 = scmp.eq.s32.totalorder (!%p202_p3), %s259_s28, 16 }
   0xd   : > { %s2069_s13 = sadd.s32 (!%p202_p3), 4294967294, %s2391_s26  ;;  %p256_p10 = scmp.eq.s32.totalorder (!%p202_p3), %s2391_s26, 0 }
   0xe   : > { %s3545_s19 = smov (!%p234_p5, %s2309_s19), 1  ;;  %vm353_vm0 = vcmask 1040384   ;;  %vm498_vm1 = vcmask 1046528   ;;  %vm631_vm2 = vcmask 1045504   ;;  %p252_p8 = scmp.gt.s32.totalorder %s2069_s13, 0  ;;  %vm764_vm3 = vcmask 64512  }
   0xf   : > { %s2208_s27 = sshll.u32 %s3545_s19, 8  ;;  %p2070_p9 = scmp.lt.s32.totalorder %s2069_s13, 15  ;;  %vm821_vm4 = vcmask 195584   ;;  %vm789_vm5 = vcmask 130048  }
  0x10   : > { %s2398_s6 = scalar_lea.vmem %s3526_s0, %s2208_s27  ;;  %s2075_s15 = sadd.s32 4294967295, %s2391_s26 }
  0x11   : > { %s2401_s7 = scalar_lea.vmem %s2398_s6, %s2213_s25  ;;  %s3551_s15 = smov (%p256_p10, %s2075_s15), 1 }
  0x12   : > { %v289_v0 = vld [vmem:[%s2401_s7 + $0x50] sm:$0xff]  ;;  %v290_v1 = vld [vmem:[%s2401_s7 + $0x58] sm:$0xff]  ;;  %v2406_v2 = vld [vmem:[%s2401_s7 + $0x40] sm:$0xff]  ;;  %s262_s8 = scalar_select %p261_p6, %s259_s28, 15 }
  0x13   : > { %v324_v3 = vrot.slane %v289_v0, 1  ;;  %v375_v4 = vrot.slane %v289_v0, 7  ;;  %v376_v5 = vrot.slane %v290_v1, 7  ;;  %v288_v6 = vld [vmem:[%s2401_s7 + $0x48] sm:$0xff]  ;;  %v372_v7 = vrot.slane %v2406_v2, 7  ;;  %v291_v18 = vld [vmem:[%s2401_s7 + $0x60] sm:$0xff] }
  0x14   : > { %v373_v8 = vrot.slane %v288_v6, 7  ;;  %v432_v9 = vrot.slane %v288_v6, 5  ;;  %s3547_s8 = smov (%p260_p7, %s262_s8), 14  ;;  %v433_v19 = vrot.slane %v290_v1, 5  ;;  %v292_v21 = vld [vmem:[%s2401_s7 + $0x68] sm:$0xff]  ;;  %v325_v25 = vrot.slane %v291_v18, 1 }
  0x15   : > { %v2411_v10 = vsel %vm353_vm0, %v375_v4, %v376_v5  ;;  %v2414_v11 = vsel %vm353_vm0, %v324_v3, %v375_v4  ;;  %v378_v26 = vrot.slane %v291_v18, 7  ;;  %s2084_s10 = sshll.u32 %s3547_s8, 4  ;;  %v379_v29 = vrot.slane %v292_v21, 7  ;;  %v293_v54 = vld [vmem:[%s2401_s7 + $0x70] sm:$0xff]  ;;  %v294_v55 = vld [vmem:[%s2401_s7 + $0x78] sm:$0xff]  ;;  %s2082_s17 = sshll.u32 %s3551_s15, 4 }
  0x16   : > { %v534_v12 = vrot.slane %v2414_v11, 1  ;;  %v535_v13 = vrot.slane %v2411_v10, 1  ;;  %v2421_v14 = vsel %vm353_vm0, %v372_v7, %v373_v8  ;;  %v468_v15 = vsel %vm353_vm0, %v373_v8, %v432_v9  ;;  %s296_s11 = scalar_lea.vmem %s2398_s6, %s2084_s10  ;;  %s274_s27 = scalar_lea.vmem %s2398_s6, %s2082_s17 }
  0x17   : > { %v530_v16 = vrot.slane %v2421_v14, 1  ;;  %v532_v17 = vrot.slane %v468_v15, 1  ;;  %v667_v23 = vrot.slane %v2414_v11, 2  ;;  %v668_v24 = vrot.slane %v2411_v10, 2  ;;  %v297_v37 = vld [vmem:[%s296_s11] sm:$0xff]  ;;  %v298_v38 = vld [vmem:[%s296_s11 + $0x8] sm:$0xff] }
  0x18   : > { %v536_v20 = vsel %vm498_vm1, %v534_v12, %v535_v13  ;;  %v663_v27 = vrot.slane %v2421_v14, 2  ;;  %v665_v28 = vrot.slane %v468_v15, 2  ;;  %v469_v30 = vsel %vm353_vm0, %v376_v5, %v433_v19  ;;  %s253_s14 = scalar_select %p252_p8, %s2069_s13, 0 }
  0x19   : > { %587 = vrot.lane.b32.xlu1 %v536_v20, %s2323_s9  ;;  %v533_v22 = vsel %vm498_vm1, %v530_v16, %v532_v17  ;;  %v537_v31 = vrot.slane %v469_v30, 1  ;;  %v669_v32 = vsel %vm631_vm2, %v667_v23, %v668_v24  ;;  %v2445_v35 = vsel %vm353_vm0, %v378_v26, %v379_v29  ;;  %v279_v23 = vld [vmem:[%s2401_s7] sm:$0xff]  ;;  %p1192_p11 = scmp.eq.s32.totalorder %s2305_s18, 0  ;;  %s264_s15 = sadd.s32 9, %s2391_s26 }
  0x1a   : > { %585 = vrot.lane.b32.xlu0 %v533_v22, %s2323_s9  ;;  %v666_v34 = vsel %vm631_vm2, %v663_v27, %v665_v28  ;;  %v2448_v36 = vsel %vm353_vm0, %v325_v25, %v378_v26  ;;  %v670_v39 = vrot.slane %v469_v30, 2  ;;  %v673_v41 = vrot.slane %v2445_v35, 2  ;;  %s3549_s14 = smov (!%p2070_p9, %s253_s14), 15  ;;  %p265_p12 = scmp.gt.s32.totalorder %s264_s15, 0 }
  0x1b   : > { %v538_v33 = vsel %vm498_vm1, %v535_v13, %v537_v31  ;;  %v672_v40 = vrot.slane %v2448_v36, 2  ;;  %v539_v42 = vrot.slane %v2448_v36, 1  ;;  %v540_v43 = vrot.slane %v2445_v35, 1  ;;  %s2081_s16 = sshll.u32 %s3549_s14, 4  ;;  %p2076_p13 = scmp.lt.s32.totalorder %s264_s15, 15 }
  0x1c   : > { %589 = vrot.lane.b32.xlu2 %v538_v33, %s2323_s9  ;;  %v327_v44 = vrot.slane %v297_v37, 1  ;;  %v384_v45 = vrot.slane %v297_v37, 7  ;;  %v385_v46 = vrot.slane %v298_v38, 7  ;;  %v434_v47 = vrot.slane %v292_v21, 5  ;;  %s270_s25 = scalar_lea.vmem %s2398_s6, %s2081_s16  ;;  %p1198_p0 = scmp.eq.s32.totalorder %s2305_s18, 1 }
  0x1d   : > { %v671_v48 = vsel %vm631_vm2, %v668_v24, %v670_v39  ;;  %v674_v49 = vsel %vm631_vm2, %v672_v40, %v673_v41  ;;  %v541_v50 = vsel %vm498_vm1, %v539_v42, %v540_v43  ;;  %v326_v60 = vrot.slane %v293_v54, 1  ;;  %v280_v24 = vld [vmem:[%s2401_s7 + $0x8] sm:$0xff]  ;;  %v271_v39 = vld [vmem:[%s270_s25] sm:$0xff]  ;;  %s1193_s14 = scalar_select %p1192_p11, 1, 0 }
  0x1e   : > { %v2461_v51 = vsel %vm353_vm0, %v384_v45, %v385_v46  ;;  %v2464_v52 = vsel %vm353_vm0, %v327_v44, %v384_v45  ;;  %v470_v53 = vsel %vm353_vm0, %v379_v29, %v434_v47  ;;  %v381_v61 = vrot.slane %v293_v54, 7  ;;  %v272_v40 = vld [vmem:[%s270_s25 + $0x8] sm:$0xff]  ;;  %v275_v42 = vld [vmem:[%s274_s27] sm:$0xff]  ;;  %s266_s16 = scalar_select %p265_p12, %s264_s15, 0 }
  0x1f   : > { %v542_v56 = vrot.slane %v470_v53, 1  ;;  %v549_v57 = vrot.slane %v2464_v52, 1  ;;  %v550_v58 = vrot.slane %v2461_v51, 1  ;;  %v675_v59 = vrot.slane %v470_v53, 2  ;;  %s1199_s30 = scalar_select %p1198_p0, 1, 0 }
  0x20   : > { %v382_v62 = vrot.slane %v294_v55, 7  ;;  %v2482_v4 = vsel %vm353_vm0, %v326_v60, %v381_v61  ;;  %v682_v5 = vrot.slane %v2464_v52, 2  ;;  %v683_v9 = vrot.slane %v2461_v51, 2  ;;  %s3553_s16 = smov (!%p2076_p13, %s266_s16), 15  ;;  %p242_p1 = scmp.lt.s32.totalorder %s2391_s26, 15 }
  0x21   : > { %720 = vrot.lane.b32.xlu1 %v669_v32, %s2324_s12  ;;  %v543_v63 = vsel %vm498_vm1, %v540_v43, %v542_v56  ;;  %v551_v0 = vsel %vm498_vm1, %v549_v57, %v550_v58  ;;  %v676_v1 = vsel %vm631_vm2, %v673_v41, %v675_v59  ;;  %v677_v6 = vrot.slane %v2482_v4, 2  ;;  %v276_v43 = vld [vmem:[%s274_s27 + $0x8] sm:$0xff]  ;;  %s2085_s17 = sshll.u32 %s3553_s16, 4 }
  0x22   : > { %718 = vrot.lane.b32.xlu0 %v666_v34, %s2324_s12  ;;  %v2479_v3 = vsel %vm353_vm0, %v381_v61, %v382_v62  ;;  %v544_v12 = vrot.slane %v2482_v4, 1  ;;  %v435_v15 = vrot.slane %v294_v55, 5  ;;  %v436_v17 = vrot.slane %v298_v38, 5  ;;  %s300_s25 = scalar_lea.vmem %s2398_s6, %s2085_s17  ;;  %s3555_s26 = smov (!%p242_p1, %s2391_s26), 15 }
  0x23   : > { %v678_v8 = vrot.slane %v2479_v3, 2  ;;  %v545_v13 = vrot.slane %v2479_v3, 1  ;;  %v684_v18 = vsel %vm631_vm2, %v682_v5, %v683_v9  ;;  %v319_v29 = vrot.slane %v279_v23, 1  ;;  %s2065_s18 = sshll.u32 %s3555_s26, 1 }
  0x24   : > { %722 = vrot.lane.b32.xlu2 %v671_v48, %s2324_s12  ;;  %v471_v21 = vsel %vm353_vm0, %v382_v62, %v435_v15  ;;  %v472_v22 = vsel %vm353_vm0, %v385_v46, %v436_v17  ;;  %v360_v30 = vrot.slane %v279_v23, 7  ;;  %v361_v31 = vrot.slane %v280_v24, 7 }
  0x25   : > { %v679_v19 = vsel %vm631_vm2, %v677_v6, %v678_v8  ;;  %v546_v20 = vsel %vm498_vm1, %v544_v12, %v545_v13  ;;  %v552_v25 = vrot.slane %v472_v22, 1  ;;  %v547_v26 = vrot.slane %v471_v21, 1 }
  0x26   : > { %v685_v28 = vrot.slane %v472_v22, 2  ;;  %v2512_v37 = vsel %vm353_vm0, %v360_v30, %v361_v31  ;;  %v2515_v38 = vsel %vm353_vm0, %v319_v29, %v360_v30  ;;  %v680_v41 = vrot.slane %v471_v21, 2  ;;  %v281_v30 = vld [vmem:[%s2401_s7 + $0x10] sm:$0xff] }
  0x27   : > { %v553_v32 = vsel %vm498_vm1, %v550_v58, %v552_v25  ;;  %v548_v33 = vsel %vm498_vm1, %v545_v13, %v547_v26  ;;  %v642_v44 = vrot.slane %v2515_v38, 2  ;;  %v643_v45 = vrot.slane %v2512_v37, 2 }
  0x28   : > { %v686_v34 = vsel %vm631_vm2, %v683_v9, %v685_v28  ;;  %v509_v46 = vrot.slane %v2515_v38, 1  ;;  %v510_v47 = vrot.slane %v2512_v37, 1  ;;  %v317_v48 = vrot.slane %v271_v39, 1 }
  0x29   : > { %724 = vrot.lane.b32.xlu1 %v674_v49, %s2324_s12  ;;  %v354_v49 = vrot.slane %v271_v39, 7  ;;  %v318_v53 = vrot.slane %v275_v42, 1  ;;  %v357_v54 = vrot.slane %v275_v42, 7  ;;  %v358_v55 = vrot.slane %v276_v43, 7 }
  0x2a   : > { %591 = vrot.lane.b32.xlu0 %v541_v50, %s2323_s9  ;;  %v355_v50 = vrot.slane %v272_v40, 7  ;;  %v681_v56 = vsel %vm631_vm2, %v678_v8, %v680_v41  ;;  %v644_v57 = vsel %vm631_vm2, %v642_v44, %v643_v45  ;;  %v511_v58 = vsel %vm498_vm1, %v509_v46, %v510_v47 }
  0x2b   : > { %v2531_v60 = vsel %vm353_vm0, %v317_v48, %v354_v49  ;;  %v2535_v61 = vsel %vm353_vm0, %v357_v54, %v358_v55  ;;  %v2538_v62 = vsel %vm353_vm0, %v318_v53, %v357_v54  ;;  %v428_v9 = vrot.slane %v280_v24, 5  ;;  %v284_v48 = vld [vmem:[%s2401_s7 + $0x28] sm:$0xff] }
  0x2c   : > { %593 = vrot.lane.b32.xlu2 %v543_v63, %s2323_s9  ;;  %v2528_v59 = vsel %vm353_vm0, %v354_v49, %v355_v50  ;;  %v499_v63 = vrot.slane %v2531_v60, 1  ;;  %v504_v6 = vrot.slane %v2538_v62, 1  ;;  %v505_v8 = vrot.slane %v2535_v61, 1 }
  0x2d   : > { %v633_v5 = vrot.slane %v2528_v59, 2  ;;  %v464_v17 = vsel %vm353_vm0, %v361_v31, %v428_v9  ;;  %v426_v22 = vrot.slane %v272_v40, 5  ;;  %v427_v23 = vrot.slane %v276_v43, 5  ;;  %v282_v31 = vld [vmem:[%s2401_s7 + $0x18] sm:$0xff] }
  0x2e   : > { %v506_v15 = vsel %vm498_vm1, %v504_v6, %v505_v8  ;;  %v512_v21 = vrot.slane %v464_v17, 1  ;;  %v320_v39 = vrot.slane %v281_v30, 1  ;;  %v363_v40 = vrot.slane %v281_v30, 7 }
  0x2f   : > { %v462_v28 = vsel %vm353_vm0, %v355_v50, %v426_v22  ;;  %v463_v29 = vsel %vm353_vm0, %v358_v55, %v427_v23  ;;  %v364_v41 = vrot.slane %v282_v31, 7 }
  0x30   : > { %v513_v26 = vsel %vm498_vm1, %v510_v47, %v512_v21  ;;  %v2574_v46 = vsel %vm353_vm0, %v320_v39, %v363_v40  ;;  %v283_v47 = vld [vmem:[%s2401_s7 + $0x20] sm:$0xff]  ;;  %v640_v49 = vrot.slane %v463_v29, 2 }
  0x31   : > { %599 = vrot.lane.b32.xlu1 %v551_v0, %s2323_s9  ;;  %v500_v0 = vrot.slane %v2528_v59, 1  ;;  %v514_v50 = vrot.slane %v2574_v46, 1  ;;  %v647_v54 = vrot.slane %v2574_v46, 2  ;;  %v2087_v21 = vld [vmem:[%s3527_s1 + $0x20] sm:$0xff] }
  0x32   : > { %726 = vrot.lane.b32.xlu0 %v676_v1, %s2324_s12  ;;  %v632_v1 = vrot.slane %v2531_v60, 2 }
  0x33   : > { %v501_v12 = vsel %vm498_vm1, %v499_v63, %v500_v0  ;;  %v367_v63 = vrot.slane %v284_v48, 7 }
  0x34   : > { %732 = vrot.lane.b32.xlu2 %v684_v18, %s2324_s12  ;;  %v634_v13 = vsel %vm631_vm2, %v632_v1, %v633_v5  ;;  %v637_v18 = vrot.slane %v2538_v62, 2 }
  0x39   : > { %728 = vrot.lane.b32.xlu1 %v679_v19, %s2324_s12  ;;  %v638_v19 = vrot.slane %v2535_v61, 2 }
  0x3a   : > { %595 = vrot.lane.b32.xlu0 %v546_v20, %s2323_s9  ;;  %v645_v20 = vrot.slane %v464_v17, 2 }
  0x3b   : > { %v639_v24 = vsel %vm631_vm2, %v637_v18, %v638_v19  ;;  %v430_v18 = vrot.slane %v284_v48, 5 }
  0x3c   : > { %601 = vrot.lane.b32.xlu2 %v553_v32, %s2323_s9  ;;  %v646_v25 = vsel %vm631_vm2, %v643_v45, %v645_v20  ;;  %v502_v32 = vrot.slane %v462_v28, 1  ;;  %v2571_v45 = vsel %vm353_vm0, %v363_v40, %v364_v41  ;;  %v2088_v20 = vld [vmem:[%s3527_s1 + $0x28] sm:$0xff] }
  0x3d   : > { %v515_v53 = vrot.slane %v2571_v45, 1  ;;  %v648_v55 = vrot.slane %v2571_v45, 2  ;;  %2214 = vmatpush.msra.mxu1 %v2088_v20  ;;  %2215 = vmatpush.msra.mxu2 %v2088_v20 }
  0x3e   : > { %v503_v42 = vsel %vm498_vm1, %v500_v0, %v502_v32  ;;  %v641_v0 = vsel %vm631_vm2, %v638_v19, %v640_v49  ;;  %895 = vmatpush.msra.mxu0 %v2088_v20 }
  0x3f   : > { %v649_v1 = vsel %vm631_vm2, %v647_v54, %v648_v55  ;;  %2216 = vmatpush.msra.mxu1 %v2087_v21  ;;  %2217 = vmatpush.msra.mxu2 %v2087_v21 }
  0x40   : > { %896 = vmatpush.msra.mxu0 %v2087_v21 }
  0x41   : > { %597 = vrot.lane.b32.xlu1 %v548_v33, %s2323_s9  ;;  %v635_v33 = vrot.slane %v462_v28, 2  ;;  %v286_v28 = vld [vmem:[%s2401_s7 + $0x38] sm:$0xff] }
  0x42   : > { %734 = vrot.lane.b32.xlu0 %v686_v34, %s2324_s12  ;;  %v507_v34 = vrot.slane %v463_v29, 1  ;;  %v431_v32 = vrot.slane %v286_v28, 5  ;;  %v370_v39 = vrot.slane %v286_v28, 7 }
  0x43   : > { %v636_v43 = vsel %vm631_vm2, %v633_v5, %v635_v33  ;;  %v516_v5 = vsel %vm498_vm1, %v514_v50, %v515_v53 }
  0x44   : > { %730 = vrot.lane.b32.xlu2 %v681_v56, %s2324_s12  ;;  %v508_v44 = vsel %vm498_vm1, %v505_v8, %v507_v34  ;;  %v429_v56 = vrot.slane %v282_v31, 5 }
  0x46   : > { %v465_v6 = vsel %vm353_vm0, %v364_v41, %v429_v56  ;;  %v2086_v41 = vld [vmem:[%s3527_s1 + $0x18] sm:$0xff] }
  0x47   : > { %v650_v17 = vrot.slane %v465_v6, 2  ;;  %2218 = vmatpush.msra.mxu1 %v2086_v41  ;;  %2219 = vmatpush.msra.mxu2 %v2086_v41 }
  0x48   : > { %897 = vmatpush.msra.mxu0 %v2086_v41 }
  0x49   : > { %700 = vrot.lane.b32.xlu1 %v644_v57, %s2324_s12  ;;  %v321_v57 = vrot.slane %v283_v47, 1  ;;  %v651_v23 = vsel %vm631_vm2, %v648_v55, %v650_v17 }
  0x4a   : > { %567 = vrot.lane.b32.xlu0 %v511_v58, %s2323_s9  ;;  %v366_v58 = vrot.slane %v283_v47, 7  ;;  %v467_v47 = vsel %vm353_vm0, %v370_v39, %v431_v32  ;;  %v814_v32 = vld [vmem:[%s3527_s1] sm:$0xff] }
  0x4c   : > { %559 = vrot.lane.b32.xlu2 %v501_v12, %s2323_s9  ;;  %v2590_v8 = vsel %vm353_vm0, %v366_v58, %v367_v63  ;;  %v2593_v9 = vsel %vm353_vm0, %v321_v57, %v366_v58  ;;  %v517_v12 = vrot.slane %v465_v6, 1  ;;  %v323_v57 = vrot.slane %v2406_v2, 1 }
  0x4d   : > { %v653_v29 = vrot.slane %v2590_v8, 2 }
  0x4e   : > { %v518_v19 = vsel %vm498_vm1, %v515_v53, %v517_v12  ;;  %v527_v53 = vrot.slane %v467_v47, 1 }
  0x51   : > { %692 = vrot.lane.b32.xlu1 %v634_v13, %s2324_s12  ;;  %v519_v13 = vrot.slane %v2593_v9, 1 }
  0x52   : > { %563 = vrot.lane.b32.xlu0 %v506_v15, %s2323_s9  ;;  %v520_v15 = vrot.slane %v2590_v8, 1 }
  0x54   : > { %696 = vrot.lane.b32.xlu2 %v639_v24, %s2324_s12  ;;  %v521_v22 = vsel %vm498_vm1, %v519_v13, %v520_v15  ;;  %v466_v24 = vsel %vm353_vm0, %v367_v63, %v430_v18 }
  0x55   : > { %v655_v30 = vrot.slane %v466_v24, 2  ;;  %v522_v31 = vrot.slane %v466_v24, 1  ;;  %v2131_v24 = vld [vmem:[%s3527_s1 + $0x40] sm:$0xff] }
  0x56   : > { %1065 = vmatpush.msrb.mxu2 %v2131_v24 }
  0x59   : > { %702 = vrot.lane.b32.xlu1 %v646_v25, %s2324_s12  ;;  %v652_v25 = vrot.slane %v2593_v9, 2 }
  0x5a   : > { %569 = vrot.lane.b32.xlu0 %v513_v26, %s2323_s9  ;;  %v285_v26 = vld [vmem:[%s2401_s7 + $0x30] sm:$0xff] }
  0x5b   : > { %v322_v33 = vrot.slane %v285_v26, 1  ;;  %v369_v34 = vrot.slane %v285_v26, 7  ;;  %v654_v40 = vsel %vm631_vm2, %v652_v25, %v653_v29  ;;  %v2130_v25 = vld [vmem:[%s3527_s1 + $0x38] sm:$0xff] }
  0x5c   : > { %561 = vrot.lane.b32.xlu2 %v503_v42, %s2323_s9  ;;  %v656_v42 = vsel %vm631_vm2, %v653_v29, %v655_v30  ;;  %1066 = vmatpush.msrb.mxu2 %v2130_v25 }
  0x5d   : > { %v2629_v48 = vsel %vm353_vm0, %v369_v34, %v370_v39  ;;  %v2632_v49 = vsel %vm353_vm0, %v322_v33, %v369_v34 }
  0x5e   : > { %v525_v50 = vrot.slane %v2629_v48, 1  ;;  %v657_v55 = vrot.slane %v2632_v49, 2  ;;  %v658_v56 = vrot.slane %v2629_v48, 2  ;;  %v524_v63 = vrot.slane %v2632_v49, 1 }
  0x60   : > { %v528_v58 = vsel %vm498_vm1, %v525_v50, %v527_v53 }
  0x61   : > { %694 = vrot.lane.b32.xlu1 %v636_v43, %s2324_s12  ;;  %v816_v43 = vld [vmem:[%s3527_s1 + $0x10] sm:$0xff] }
  0x62   : > { %565 = vrot.lane.b32.xlu0 %v508_v44, %s2323_s9  ;;  %v523_v44 = vsel %vm498_vm1, %v520_v15, %v522_v31  ;;  %978 = vmatpush.msrb.mxu1 %v816_v43  ;;  %v660_v15 = vrot.slane %v467_v47, 2  ;;  %v2129_v31 = vld [vmem:[%s3527_s1 + $0x30] sm:$0xff] }
  0x63   : > { %1067 = vmatpush.msrb.mxu2 %v2129_v31 }
  0x64   : > { %698 = vrot.lane.b32.xlu2 %v641_v0, %s2324_s12  ;;  %v659_v0 = vsel %vm631_vm2, %v657_v55, %v658_v56  ;;  %v661_v17 = vsel %vm631_vm2, %v658_v56, %v660_v15 }
  0x69   : > { %704 = vrot.lane.b32.xlu1 %v649_v1, %s2324_s12  ;;  %v2646_v1 = vsel %vm353_vm0, %v323_v57, %v372_v7 }
  0x6a   : > { %571 = vrot.lane.b32.xlu0 %v516_v5, %s2323_s9  ;;  %v526_v5 = vsel %vm498_vm1, %v524_v63, %v525_v50  ;;  %v662_v6 = vrot.slane %v2646_v1, 2  ;;  %v529_v12 = vrot.slane %v2646_v1, 1 }
  0x6c   : > { %573 = vrot.lane.b32.xlu2 %v518_v19, %s2323_s9  ;;  %v664_v2 = vsel %vm631_vm2, %v662_v6, %v663_v27  ;;  %v531_v7 = vsel %vm498_vm1, %v529_v12, %v530_v16  ;;  %v815_v27 = vld [vmem:[%s3527_s1 + $0x8] sm:$0xff] }
  0x6d   : > { %979 = vmatpush.msrb.mxu1 %v815_v27 }
  0x6f   : > { %980 = vmatpush.msrb.mxu1 %v814_v32 }
  0x71   : > { %575 = vrot.lane.b32.xlu1 %v521_v22, %s2323_s9 }
  0x72   : > { %706 = vrot.lane.b32.xlu0 %v651_v23, %s2324_s12 }
  0x74   : > { %708 = vrot.lane.b32.xlu2 %v654_v40, %s2324_s12 }
  0x76   : > { %v590_v54 = vpop.permute.xlu2 %589 }
  0x79   : > { %710 = vrot.lane.b32.xlu1 %v656_v42, %s2324_s12 }
  0x7a   : > { %577 = vrot.lane.b32.xlu0 %v523_v44, %s2323_s9 }
  0x7c   : > { %579 = vrot.lane.b32.xlu2 %v526_v5, %s2323_s9 }
  0x7e   : > { %v723_v13 = vpop.permute.xlu2 %722 }
  0x81   : > { %581 = vrot.lane.b32.xlu1 %v528_v58, %s2323_s9 }
  0x82   : > { %712 = vrot.lane.b32.xlu0 %v659_v0, %s2324_s12 }
  0x84   : > { %714 = vrot.lane.b32.xlu2 %v661_v17, %s2324_s12 }
  0x86   : > { %v594_v20 = vpop.permute.xlu2 %593 }
  0x87   : > { %v782_v53 = vsel %vm764_vm3, %v2445_v35, %v594_v20 }
  0x89   : > { %716 = vrot.lane.b32.xlu1 %v664_v2, %s2324_s12 }
  0x8a   : > { %583 = vrot.lane.b32.xlu0 %v531_v7, %s2323_s9 }
  0x8b   : > { %v588_v18 = vpop.permute.xlu1 %587 }
  0x8c   : > { %v586_v19 = vpop.permute.xlu0 %585  ;;  %v779_v28 = vsel %vm764_vm3, %v2414_v11, %v588_v18  ;;  %v780_v11 = vsel %vm764_vm3, %v2411_v10, %v590_v54 }
  0x8d   : > { %v778_v16 = vsel %vm764_vm3, %v2421_v14, %v586_v19  ;;  %v2698_v41 = vsel %vm789_vm5, %v780_v11, %v723_v13 }
  0x8e   : > { %v733_v26 = vpop.permute.xlu2 %732 }
  0x93   : > { %v721_v21 = vpop.permute.xlu1 %720 }
  0x94   : > { %v719_v22 = vpop.permute.xlu0 %718  ;;  %v2683_v30 = vsel %vm789_vm5, %v779_v28, %v721_v21 }
  0x95   : > { %v2670_v23 = vsel %vm789_vm5, %v778_v16, %v719_v22 }
  0x96   : > { %2100 = vmatmul.msk.f32.vlgmr.msra.gmra.mxu1 %vm821_vm4, %v2670_v23  ;;  %v602_v33 = vpop.permute.xlu2 %601 }
  0x97   : > { %v786_v54 = vsel %vm764_vm3, %v2461_v51, %v602_v33 }
  0x9b   : > { %v725_v14 = vpop.permute.xlu1 %724 }
  0x9c   : > { %v592_v29 = vpop.permute.xlu0 %591 }
  0x9d   : > { %v781_v10 = vsel %vm764_vm3, %v2448_v36, %v592_v29 }
  0x9e   : > { %2101 = vmatmul.msk.f32.gmra.mxu1 %vm821_vm4, %v2683_v30  ;;  %v731_v44 = vpop.permute.xlu2 %730 }
  0xa3   : > { %v600_v34 = vpop.permute.xlu1 %599 }
  0xa4   : > { %v785_v39 = vsel %vm764_vm3, %v2464_v52, %v600_v34  ;;  %v727_v40 = vpop.permute.xlu0 %726  ;;  %v2710_v52 = vsel %vm789_vm5, %v781_v10, %v725_v14 }
  0xa5   : > { %v2701_v42 = vsel %vm789_vm5, %v785_v39, %v733_v26  ;;  %v2719_v56 = vsel %vm789_vm5, %v782_v53, %v727_v40 }
  0xa6   : > { %2102 = vmatmul.msk.f32.gmra.mxu1 %vm821_vm4, %v2698_v41  ;;  %2107 = vmatmul.msk.f32.vlgmr.msra.gmra.mxu2 %vm821_vm4, %v2701_v42  ;;  %v560_v57 = vpop.permute.xlu2 %559 }
  0xab   : > { %v729_v43 = vpop.permute.xlu1 %728 }
  0xac   : > { %v596_v47 = vpop.permute.xlu0 %595 }
  0xad   : > { %v783_v35 = vsel %vm764_vm3, %v2482_v4, %v596_v47 }
  0xae   : > { %2103 = vmatmul.msk.f32.gmra.mxu1 %vm821_vm4, %v2710_v52  ;;  %v2733_v0 = vsel %vm789_vm5, %v783_v35, %v729_v43  ;;  %v697_v6 = vpop.permute.xlu2 %696 }
  0xb3   : > { %v598_v50 = vpop.permute.xlu1 %597 }
  0xb4   : > { %v735_v55 = vpop.permute.xlu0 %734  ;;  %v784_v12 = vsel %vm764_vm3, %v2479_v3, %v598_v50  ;;  %v765_v3 = vsel %vm764_vm3, %v2531_v60, %v560_v57 }
  0xb5   : > { %v2722_v36 = vsel %vm789_vm5, %v786_v54, %v735_v55 }
  0xb6   : > { %2104 = vmatmul.msk.f32.gmra.mxu1 %vm821_vm4, %v2719_v56  ;;  %2108 = vmatmul.msk.f32.gmra.mxu2 %vm821_vm4, %v2722_v36  ;;  %v562_v7 = vpop.permute.xlu2 %561 }
  0xb7   : > { %v766_v27 = vsel %vm764_vm3, %v2528_v59, %v562_v7 }
  0xbb   : > { %v701_v58 = vpop.permute.xlu1 %700 }
  0xbc   : > { %v568_v63 = vpop.permute.xlu0 %567 }
  0xbd   : > { %v769_v51 = vsel %vm764_vm3, %v2515_v38, %v568_v63  ;;  %v2744_v38 = vsel %vm789_vm5, %v784_v12, %v731_v44 }
  0xbe   : > { %2105 = vmatmul.msk.f32.gmra.mxu1 %vm821_vm4, %v2733_v0  ;;  %v794_v5 = vsel %vm789_vm5, %v769_v51, %v701_v58  ;;  %v699_v16 = vpop.permute.xlu2 %698 }
  0xbf   : > { %2132 = vmatmul.msk.f32.vlgmr.msrb.gmra.mxu2 %vm821_vm4, %v794_v5 }
  0xc3   : > { %v693_v4 = vpop.permute.xlu1 %692 }
  0xc4   : > { %v564_v13 = vpop.permute.xlu0 %563  ;;  %v790_v19 = vsel %vm789_vm5, %v765_v3, %v693_v4 }
  0xc5   : > { %v767_v2 = vsel %vm764_vm3, %v2538_v62, %v564_v13 }
  0xc6   : > { %2106 = vmatmul.msk.f32.gmra.mxu1 %vm821_vm4, %v2744_v38  ;;  %v792_v15 = vsel %vm789_vm5, %v767_v2, %v697_v6 }
  0xc7   : > { %2089 = vmatmul.msk.f32.vlgmr.msra.gmra.mxu0 %vm821_vm4, %v792_v15 }
  0xcb   : > { %v703_v17 = vpop.permute.xlu1 %702 }
  0xcc   : > { %v570_v18 = vpop.permute.xlu0 %569 }
  0xcd   : > { %v770_v62 = vsel %vm764_vm3, %v2512_v37, %v570_v18 }
  0xce   : > { %2109 = vmatmul.msk.f32.vlgmr.msrb.gmra.mxu1 %vm821_vm4, %v790_v19  ;;  %v795_v20 = vsel %vm789_vm5, %v770_v62, %v703_v17 }
  0xcf   : > { %2133 = vmatmul.msk.f32.gmra.mxu2 %vm821_vm4, %v795_v20 }
  0xd3   : > { %v695_v21 = vpop.permute.xlu1 %694 }
  0xd4   : > { %v566_v22 = vpop.permute.xlu0 %565  ;;  %v791_v60 = vsel %vm789_vm5, %v766_v27, %v695_v21 }
  0xd5   : > { %v768_v24 = vsel %vm764_vm3, %v2535_v61, %v566_v22  ;;  %v574_v61 = vpop.permute.xlu2 %573 }
  0xd6   : > { %2110 = vmatmul.msk.f32.gmra.mxu1 %vm821_vm4, %v791_v60  ;;  %v793_v37 = vsel %vm789_vm5, %v768_v24, %v699_v16  ;;  %v772_v28 = vsel %vm764_vm3, %v2571_v45, %v574_v61 }
  0xd7   : > { %2090 = vmatmul.msk.f32.gmra.mxu0 %vm821_vm4, %v793_v37 }
  0xdb   : > { %v705_v25 = vpop.permute.xlu1 %704 }
  0xdc   : > { %v572_v26 = vpop.permute.xlu0 %571 }
  0xdd   : > { %v771_v14 = vsel %vm764_vm3, %v2574_v46, %v572_v26  ;;  %v709_v33 = vpop.permute.xlu2 %708 }
  0xde   : > { %2111 = vmatmul.msk.f32.gmra.mxu1 %vm821_vm4, %v792_v15  ;;  %v796_v59 = vsel %vm789_vm5, %v771_v14, %v705_v25 }
  0xdf   : > { %2091 = vmatmul.msk.f32.gmra.mxu0 %vm821_vm4, %v794_v5  ;;  %2134 = vmatmul.msk.f32.gmra.mxu2 %vm821_vm4, %v796_v59 }
  0xe3   : > { %v576_v32 = vpop.permute.xlu1 %575 }
  0xe4   : > { %v707_v29 = vpop.permute.xlu0 %706  ;;  %v773_v46 = vsel %vm764_vm3, %v2593_v9, %v576_v32 }
  0xe5   : > { %v797_v31 = vsel %vm789_vm5, %v772_v28, %v707_v29  ;;  %v798_v11 = vsel %vm789_vm5, %v773_v46, %v709_v33  ;;  %v580_v10 = vpop.permute.xlu2 %579  ;;  %v1194_v29 = vstv %s1193_s14 }
  0xe6   : > { %2112 = vmatmul.msk.f32.gmra.mxu1 %vm821_vm4, %v793_v37  ;;  %v775_v9 = vsel %vm764_vm3, %v2632_v49, %v580_v10  ;;  %vm2893_vm6 = vcmp.eq.s32.totalorder %v1194_v29, 1 }
  0xe7   : > { %2092 = vmatmul.msk.f32.gmra.mxu0 %vm821_vm4, %v795_v20  ;;  %2135 = vmatmul.msk.f32.gmra.mxu2 %vm821_vm4, %v797_v31 }
  0xeb   : > { %v711_v39 = vpop.permute.xlu1 %710 }
  0xec   : > { %v578_v34 = vpop.permute.xlu0 %577 }
  0xed   : > { %v774_v45 = vsel %vm764_vm3, %v2590_v8, %v578_v34  ;;  %v715_v50 = vpop.permute.xlu2 %714 }
  0xee   : > { %2113 = vmatmul.msk.f32.gmra.mxu1 %vm821_vm4, %v794_v5  ;;  %v799_v40 = vsel %vm789_vm5, %v774_v45, %v711_v39 }
  0xef   : > { %2093 = vmatmul.msk.f32.gmra.mxu0 %vm821_vm4, %v796_v59  ;;  %2136 = vmatmul.msk.f32.gmra.mxu2 %vm821_vm4, %v798_v11 }
  0xf3   : > { %v582_v47 = vpop.permute.xlu1 %581 }
  0xf4   : > { %v713_v43 = vpop.permute.xlu0 %712  ;;  %v776_v8 = vsel %vm764_vm3, %v2629_v48, %v582_v47 }
  0xf5   : > { %v800_v44 = vsel %vm789_vm5, %v775_v9, %v713_v43  ;;  %v801_v53 = vsel %vm789_vm5, %v776_v8, %v715_v50 }
  0xf6   : > { %2114 = vmatmul.msk.f32.gmra.mxu1 %vm821_vm4, %v795_v20 }
  0xf7   : > { %2094 = vmatmul.msk.f32.gmra.mxu0 %vm821_vm4, %v797_v31  ;;  %2137 = vmatmul.msk.f32.gmra.mxu2 %vm821_vm4, %v799_v40 }
  0xfb   : > { %v717_v55 = vpop.permute.xlu1 %716 }
  0xfc   : > { %v584_v54 = vpop.permute.xlu0 %583 }
  0xfd   : > { %v777_v49 = vsel %vm764_vm3, %v2646_v1, %v584_v54 }
  0xfe   : > { %2115 = vmatmul.msk.f32.gmra.mxu1 %vm821_vm4, %v796_v59  ;;  %v802_v57 = vsel %vm789_vm5, %v777_v49, %v717_v55 }
  0xff   : > { %2095 = vmatmul.msk.f32.gmra.mxu0 %vm821_vm4, %v798_v11  ;;  %2138 = vmatmul.msk.f32.gmra.mxu2 %vm821_vm4, %v800_v44 }
 0x106   : > { %2116 = vmatmul.msk.f32.gmra.mxu1 %vm821_vm4, %v797_v31 }
 0x107   : > { %2096 = vmatmul.msk.f32.gmra.mxu0 %vm821_vm4, %v799_v40  ;;  %2139 = vmatmul.msk.f32.gmra.mxu2 %vm821_vm4, %v801_v53 }
 0x10e   : > { %2117 = vmatmul.msk.f32.gmra.mxu1 %vm821_vm4, %v798_v11 }
 0x10f   : > { %2097 = vmatmul.msk.f32.gmra.mxu0 %vm821_vm4, %v800_v44  ;;  %2140 = vmatmul.msk.f32.gmra.mxu2 %vm821_vm4, %v802_v57 }
 0x113   : > { %v2808_v48 = vpop.f32.mrf.mxu1 }
 0x116   : > { %2118 = vmatmul.msk.f32.gmra.mxu1 %vm821_vm4, %v799_v40 }
 0x117   : > { %2098 = vmatmul.msk.f32.gmra.mxu0 %vm821_vm4, %v801_v53  ;;  %2141 = vmatmul.msk.f32.gmra.mxu2 %vm821_vm4, %v2670_v23 }
 0x11b   : > { %v2814_v35 = vpop.f32.mrf.mxu1 }
 0x11e   : > { %2119 = vmatmul.msk.f32.gmra.mxu1 %vm821_vm4, %v800_v44 }
 0x11f   : > { %2099 = vmatmul.msk.f32.gmra.mxu0 %vm821_vm4, %v802_v57  ;;  %2142 = vmatmul.msk.f32.gmra.mxu2 %vm821_vm4, %v2683_v30 }
 0x123   : > { %v2820_v1 = vpop.f32.mrf.mxu1 }
 0x126   : > { %2120 = vmatmul.msk.f32.gmra.mxu1 %vm821_vm4, %v801_v53 }
 0x127   : > { %2143 = vmatmul.msk.f32.gmra.mxu2 %vm821_vm4, %v2698_v41 }
 0x129   : > { %v2838_v5 = vpop.f32.mrf.mxu2 }
 0x12b   : > { %v2825_v58 = vpop.f32.mrf.mxu1 }
 0x12e   : > { %2121 = vmatmul.msk.f32.gmra.mxu1 %vm821_vm4, %v802_v57 }
 0x12f   : > { %2144 = vmatmul.msk.f32.gmra.mxu2 %vm821_vm4, %v2710_v52 }
 0x133   : > { %v2830_v63 = vpop.f32.mrf.mxu1 }
 0x136   : > { %2122 = vmatmul.msk.f32.gmra.mxu1 %vm821_vm4, %v2670_v23 }
 0x137   : > { %2145 = vmatmul.msk.f32.gmra.mxu2 %vm821_vm4, %v2719_v56 }
 0x139   : > { %v2846_v12 = vpop.f32.mrf.mxu2 }
 0x13b   : > { %v2836_v51 = vpop.f32.mrf.mxu1 }
 0x13e   : > { %2123 = vmatmul.msk.f32.gmra.mxu1 %vm821_vm4, %v2683_v30 }
 0x13f   : > { %2146 = vmatmul.msk.f32.gmra.mxu2 %vm821_vm4, %v2733_v0 }
 0x142   : > { %v1069_v13 = vpop.f32.mrf.mxu2 }
 0x143   : > { %v2844_v6 = vpop.f32.mrf.mxu1 }
 0x144   : > { %v899_v4 = vpop.f32.mrf.mxu0 }
 0x146   : > { %2124 = vmatmul.msk.f32.gmra.mxu1 %vm821_vm4, %v2698_v41 }
 0x147   : > { %2147 = vmatmul.msk.f32.gmra.mxu2 %vm821_vm4, %v2744_v38 }
 0x14b   : > { %v982_v23 = vpop.f32.mrf.mxu1 }
 0x14c   : > { %v983_v21 = vadd.f32 %v982_v23, %v899_v4 }
 0x14e   : > { %2125 = vmatmul.msk.f32.gmra.mxu1 %vm821_vm4, %v2710_v52  ;;  %v1129_v37 = vadd.f32 %v1069_v13, %v983_v21 }
 0x14f   : > { %2148 = vmatmul.msk.f32.gmra.mxu2 %vm821_vm4, %v2701_v42 }
 0x152   : > { %v1072_v7 = vpop.f32.mrf.mxu2 }
 0x153   : > { %v985_v30 = vpop.f32.mrf.mxu1 }
 0x154   : > { %v902_v2 = vpop.f32.mrf.mxu0 }
 0x155   : > { %v986_v15 = vadd.f32 %v985_v30, %v902_v2 }
 0x156   : > { %2126 = vmatmul.msk.f32.gmra.mxu1 %vm821_vm4, %v2719_v56  ;;  %v2867_v56 = vld [vmem:[%s3529_s3] ss:$0 sm:$0xff] }
 0x157   : > { %v1130_v41 = vadd.f32 %v1072_v7, %v986_v15  ;;  %2149 = vmatmul.msk.f32.gmra.mxu2 %vm821_vm4, %v2722_v36  ;;  %v1152_v61 = vadd.f32 %v2867_v56, %v1129_v37 }
 0x159   : > { %v1172_v45 = vmax.f32 %v1152_v61, 0.0  ;;  %v1153_v9 = vadd.f32 %v2867_v56, %v1130_v41 }
 0x15b   : > { %v988_v17 = vpop.f32.mrf.mxu1  ;;  %v1173_v50 = vmax.f32 %v1153_v9, 0.0 }
 0x15c   : > { %v905_v3 = vpop.f32.mrf.mxu0 }
 0x15d   : > { %v989_v52 = vadd.f32 %v988_v17, %v905_v3 }
 0x15e   : > { %2127 = vmatmul.msk.f32.gmra.mxu1 %vm821_vm4, %v2733_v0 }
 0x162   : > { %v1075_v18 = vpop.f32.mrf.mxu2 }
 0x163   : > { %v1131_v42 = vadd.f32 %v1075_v18, %v989_v52  ;;  %v991_v19 = vpop.f32.mrf.mxu1 }
 0x164   : > { %v908_v62 = vpop.f32.mrf.mxu0 }
 0x165   : > { %v992_v20 = vadd.f32 %v991_v19, %v908_v62  ;;  %v2870_v36 = vadd.f32 %v2867_v56, %v1131_v42 }
 0x166   : > { %2128 = vmatmul.msk.f32.gmra.mxu1 %vm821_vm4, %v2744_v38 }
 0x167   : > { %v1174_v60 = vmax.f32 %v2870_v36, 0.0 }
 0x169   : > { %v2880_v26 = vrot.slane %v1174_v60, 7 }
 0x16a   : > { %v1078_v27 = vpop.f32.mrf.mxu2 }
 0x16b   : > { %v1132_v0 = vadd.f32 %v1078_v27, %v992_v20  ;;  %v994_v16 = vpop.f32.mrf.mxu1 }
 0x16c   : > { %v911_v22 = vpop.f32.mrf.mxu0 }
 0x16d   : > { %v2875_v24 = vadd.f32 %v2867_v56, %v1132_v0  ;;  %v995_v38 = vadd.f32 %v994_v16, %v911_v22  ;;  %v301_v16 = vld [vmem:[%s300_s25] sm:$0xff]  ;;  %v2938_v22 = vld [vmem:[%s300_s25 + $0x8] sm:$0xff] }
 0x16e   : > { %v328_v37 = vrot.slane %v301_v16, 1 }
 0x16f   : > { %v1175_v25 = vmax.f32 %v2875_v24, 0.0 }
 0x171   : > { %v2884_v14 = vrot.slane %v1175_v25, 7 }
 0x172   : > { %v1081_v59 = vpop.f32.mrf.mxu2 }
 0x173   : > { %v1133_v28 = vadd.f32 %v1081_v59, %v995_v38  ;;  %v997_v31 = vpop.f32.mrf.mxu1  ;;  %v2890_v32 = vsel %vm353_vm0, %v2880_v26, %v2884_v14  ;;  %v387_v59 = vrot.slane %v301_v16, 7 }
 0x174   : > { %v914_v46 = vpop.f32.mrf.mxu0 }
 0x175   : > { %v1156_v33 = vadd.f32 %v2867_v56, %v1133_v28  ;;  %v998_v11 = vadd.f32 %v997_v31, %v914_v46  ;;  %v388_v31 = vrot.slane %v2938_v22, 7 }
 0x177   : > { %v2897_v39 = vmax.f32 %v1156_v33, 0.0 }
 0x179   : > { %v2903_v40 = vsel %vm2893_vm6, %v2897_v39, %v1172_v45  ;;  %v1250_v54 = vrot.slane %v2897_v39, 7 }
 0x17a   : > { %v1084_v10 = vpop.f32.mrf.mxu2  ;;  %v1244_v23 = vrot.slane %v2903_v40, 7 }
 0x17b   : > { %v1134_v43 = vadd.f32 %v1084_v10, %v998_v11  ;;  %v1000_v44 = vpop.f32.mrf.mxu1 }
 0x17c   : > { %v917_v47 = vpop.f32.mrf.mxu0 }
 0x17d   : > { %v1157_v8 = vadd.f32 %v2867_v56, %v1134_v43  ;;  %v1001_v57 = vadd.f32 %v1000_v44, %v917_v47 }
 0x17f   : > { %v2907_v53 = vmax.f32 %v1157_v8, 0.0 }
 0x181   : > { %v2913_v49 = vsel %vm2893_vm6, %v2907_v53, %v1173_v50  ;;  %v1251_v55 = vrot.slane %v2907_v53, 7  ;;  %v2951_v50 = vsel %vm353_vm0, %v387_v59, %v388_v31 }
 0x182   : > { %v1245_v4 = vrot.slane %v2913_v49, 7  ;;  %v1087_v13 = vpop.f32.mrf.mxu2 }
 0x183   : > { %v1135_v30 = vadd.f32 %v1087_v13, %v1001_v57  ;;  %v1003_v2 = vpop.f32.mrf.mxu1  ;;  %v2923_v15 = vsel %vm353_vm0, %v1250_v54, %v1251_v55  ;;  %v2954_v57 = vsel %vm353_vm0, %v328_v37, %v387_v59 }
 0x184   : > { %v920_v7 = vpop.f32.mrf.mxu0  ;;  %v2930_v41 = vsel %vm353_vm0, %v1244_v23, %v1245_v4 }
 0x185   : > { %v1158_v17 = vadd.f32 %v2867_v56, %v1135_v30  ;;  %v1004_v42 = vadd.f32 %v1003_v2, %v920_v7  ;;  %v554_v7 = vrot.slane %v2954_v57, 1 }
 0x187   : > { %v1178_v3 = vmax.f32 %v1158_v17, 0.0  ;;  %v555_v17 = vrot.slane %v2951_v50, 1 }
 0x189   : > { %v1217_v52 = vrot.slane %v1178_v3, 1  ;;  %v1253_v18 = vrot.slane %v1178_v3, 7 }
 0x18a   : > { %v1090_v19 = vpop.f32.mrf.mxu2 }
 0x18b   : > { %v1136_v62 = vadd.f32 %v1090_v19, %v1004_v42  ;;  %v1006_v20 = vpop.f32.mrf.mxu1  ;;  %v2935_v27 = vsel %vm353_vm0, %v1217_v52, %v1253_v18 }
 0x18c   : > { %v923_v21 = vpop.f32.mrf.mxu0 }
 0x18d   : > { %v1159_v0 = vadd.f32 %v2867_v56, %v1136_v62  ;;  %v1007_v29 = vadd.f32 %v1006_v20, %v923_v21  ;;  %v556_v20 = vsel %vm498_vm1, %v554_v7, %v555_v17 }
 0x18f   : > { %v1179_v38 = vmax.f32 %v1159_v0, 0.0 }
 0x191   : > { %v1254_v61 = vrot.slane %v1179_v38, 7  ;;  %v1307_v28 = vrot.slane %v1179_v38, 5 }
 0x192   : > { %v1093_v46 = vpop.f32.mrf.mxu2 }
 0x193   : > { %v1137_v33 = vadd.f32 %v1093_v46, %v1007_v29  ;;  %v1009_v11 = vpop.f32.mrf.mxu1  ;;  %v2942_v34 = vsel %vm353_vm0, %v1253_v18, %v1254_v61  ;;  %v1337_v45 = vsel %vm353_vm0, %v1254_v61, %v1307_v28 }
 0x194   : > { %v926_v10 = vpop.f32.mrf.mxu0  ;;  %v1490_v9 = vrot.slane %v2942_v34, 2  ;;  %v1492_v43 = vrot.slane %v1337_v45, 2  ;;  %v1380_v44 = vrot.slane %v2942_v34, 1  ;;  %v1382_v47 = vrot.slane %v1337_v45, 1 }
 0x195   : > { %v1160_v8 = vadd.f32 %v2867_v56, %v1137_v33  ;;  %v1010_v3 = vadd.f32 %v1009_v11, %v926_v10 }
 0x196   : > { %v1493_v13 = vsel %vm631_vm2, %v1490_v9, %v1492_v43  ;;  %v1383_v30 = vsel %vm498_vm1, %v1380_v44, %v1382_v47 }
 0x197   : > { %1538 = vrot.lane.b32.xlu0 %v1493_v13, %s2324_s12  ;;  %1428 = vrot.lane.b32.xlu2 %v1383_v30, %s2323_s9  ;;  %v1180_v2 = vmax.f32 %v1160_v8, 0.0 }
 0x199   : > { %v1218_v19 = vrot.slane %v1180_v2, 1  ;;  %v1256_v62 = vrot.slane %v1180_v2, 7 }
 0x19a   : > { %v1096_v52 = vpop.f32.mrf.mxu2 }
 0x19b   : > { %v1138_v18 = vadd.f32 %v1096_v52, %v1010_v3  ;;  %v1012_v42 = vpop.f32.mrf.mxu1  ;;  %v2972_v38 = vsel %vm353_vm0, %v1218_v19, %v1256_v62  ;;  %v687_v3 = vrot.slane %v2954_v57, 2  ;;  %v688_v52 = vrot.slane %v2951_v50, 2 }
 0x19c   : > { %v929_v0 = vpop.f32.mrf.mxu0  ;;  %v1494_v45 = vrot.slane %v2972_v38, 2  ;;  %v1384_v47 = vrot.slane %v2972_v38, 1  ;;  %v437_v19 = vrot.slane %v2938_v22, 5 }
 0x19d   : > { %v1161_v21 = vadd.f32 %v2867_v56, %v1138_v18  ;;  %v1013_v61 = vadd.f32 %v1012_v42, %v929_v0 }
 0x19f   : > { %v1181_v16 = vmax.f32 %v1161_v21, 0.0  ;;  %603 = vrot.lane.b32.xlu0 %v556_v20, %s2323_s9 }
 0x1a1   : > { %v1257_v37 = vrot.slane %v1181_v16, 7  ;;  %v1308_v59 = vrot.slane %v1181_v16, 5  ;;  %v689_v16 = vsel %vm631_vm2, %v687_v3, %v688_v52 }
 0x1a2   : > { %v1099_v28 = vpop.f32.mrf.mxu2 }
 0x1a3   : > { %v1139_v29 = vadd.f32 %v1099_v28, %v1013_v61  ;;  %v1015_v46 = vpop.f32.mrf.mxu1  ;;  %v2975_v33 = vsel %vm353_vm0, %v1256_v62, %v1257_v37  ;;  %v1338_v11 = vsel %vm353_vm0, %v1257_v37, %v1308_v59  ;;  %v473_v28 = vsel %vm353_vm0, %v388_v31, %v437_v19 }
 0x1a4   : > { %v1495_v10 = vrot.slane %v2975_v33, 2  ;;  %v1497_v43 = vrot.slane %v1338_v11, 2  ;;  %v1385_v8 = vrot.slane %v2975_v33, 1  ;;  %v1016_v42 = vadd.f32 %v1015_v46, %v2808_v48 }
 0x1a5   : > { %v1162_v13 = vadd.f32 %v2867_v56, %v1139_v29  ;;  %v1387_v20 = vrot.slane %v1338_v11, 1  ;;  %v690_v48 = vrot.slane %v473_v28, 2 }
 0x1a6   : > { %v1498_v30 = vsel %vm631_vm2, %v1495_v10, %v1497_v43  ;;  %v1496_v2 = vsel %vm631_vm2, %v1494_v45, %v1495_v10  ;;  %v1386_v7 = vsel %vm498_vm1, %v1384_v47, %v1385_v8  ;;  %v557_v10 = vrot.slane %v473_v28, 1 }
 0x1a7   : > { %1542 = vrot.lane.b32.xlu0 %v1498_v30, %s2324_s12  ;;  %1540 = vrot.lane.b32.xlu2 %v1496_v2, %s2324_s12  ;;  %v1182_v18 = vmax.f32 %v1162_v13, 0.0  ;;  %v1388_v29 = vsel %vm498_vm1, %v1385_v8, %v1387_v20  ;;  %v691_v8 = vsel %vm631_vm2, %v688_v52, %v690_v48 }
 0x1a8   : > { %1430 = vrot.lane.b32.xlu1 %v1386_v7, %s2323_s9 }
 0x1a9   : > { %v1219_v37 = vrot.slane %v1182_v18, 1  ;;  %v1259_v59 = vrot.slane %v1182_v18, 7 }
 0x1aa   : > { %v1102_v62 = vpop.f32.mrf.mxu2 }
 0x1ab   : > { %v1140_v21 = vadd.f32 %v1102_v62, %v1016_v42  ;;  %v1018_v0 = vpop.f32.mrf.mxu1  ;;  %v3003_v43 = vsel %vm353_vm0, %v1219_v37, %v1259_v59 }
 0x1ac   : > { %v1019_v11 = vadd.f32 %v1018_v0, %v2814_v35  ;;  %v1389_v2 = vrot.slane %v3003_v43, 1  ;;  %v558_v35 = vsel %vm498_vm1, %v555_v17, %v557_v10  ;;  %v1499_v28 = vrot.slane %v3003_v43, 2 }
 0x1ad   : > { %v1163_v61 = vadd.f32 %v2867_v56, %v1140_v21 }
 0x1af   : > { %v1183_v45 = vmax.f32 %v1163_v61, 0.0  ;;  %1432 = vrot.lane.b32.xlu2 %v1388_v29, %s2323_s9 }
 0x1b0   : > { %736 = vrot.lane.b32.xlu1 %v689_v16, %s2324_s12 }
 0x1b1   : > { %v1260_v46 = vrot.slane %v1183_v45, 7  ;;  %v1309_v13 = vrot.slane %v1183_v45, 5 }
 0x1b2   : > { %v1105_v47 = vpop.f32.mrf.mxu2 }
 0x1b3   : > { %v1141_v22 = vadd.f32 %v1105_v47, %v1019_v11  ;;  %v1021_v30 = vpop.f32.mrf.mxu1  ;;  %v3006_v31 = vsel %vm353_vm0, %v1259_v59, %v1260_v46  ;;  %v1339_v42 = vsel %vm353_vm0, %v1260_v46, %v1309_v13 }
 0x1b4   : > { %v1390_v7 = vrot.slane %v3006_v31, 1  ;;  %v1022_v52 = vadd.f32 %v1021_v30, %v2820_v1  ;;  %v1392_v20 = vrot.slane %v1339_v42, 1  ;;  %v1500_v21 = vrot.slane %v3006_v31, 2 }
 0x1b5   : > { %v1164_v3 = vadd.f32 %v2867_v56, %v1141_v22  ;;  %v1502_v0 = vrot.slane %v1339_v42, 2 }
 0x1b6   : > { %v1391_v18 = vsel %vm498_vm1, %v1389_v2, %v1390_v7  ;;  %v1393_v29 = vsel %vm498_vm1, %v1390_v7, %v1392_v20  ;;  %v1501_v1 = vsel %vm631_vm2, %v1499_v28, %v1500_v21 }
 0x1b7   : > { %738 = vrot.lane.b32.xlu2 %v691_v8, %s2324_s12  ;;  %1434 = vrot.lane.b32.xlu0 %v1391_v18, %s2323_s9  ;;  %v1184_v19 = vmax.f32 %v1164_v3, 0.0  ;;  %v1503_v45 = vsel %vm631_vm2, %v1500_v21, %v1502_v0 }
 0x1b8   : > { %605 = vrot.lane.b32.xlu1 %v558_v35, %s2323_s9 }
 0x1b9   : > { %v1220_v37 = vrot.slane %v1184_v19, 1  ;;  %v1262_v59 = vrot.slane %v1184_v19, 7 }
 0x1ba   : > { %v1108_v62 = vpop.f32.mrf.mxu2 }
 0x1bb   : > { %v1142_v16 = vadd.f32 %v1108_v62, %v1022_v52  ;;  %v1024_v17 = vpop.f32.mrf.mxu1  ;;  %v3031_v46 = vsel %vm353_vm0, %v1220_v37, %v1262_v59 }
 0x1bc   : > { %v1025_v47 = vadd.f32 %v1024_v17, %v2825_v58  ;;  %v1504_v2 = vrot.slane %v3031_v46, 2  ;;  %v1394_v35 = vrot.slane %v3031_v46, 1 }
 0x1bd   : > { %v1165_v61 = vadd.f32 %v2867_v56, %v1142_v16 }
 0x1bf   : > { %v1185_v48 = vmax.f32 %v1165_v61, 0.0  ;;  %1436 = vrot.lane.b32.xlu2 %v1393_v29, %s2323_s9  ;;  %1546 = vrot.lane.b32.xlu0 %v1503_v45, %s2324_s12 }
 0x1c0   : > { %1544 = vrot.lane.b32.xlu1 %v1501_v1, %s2324_s12 }
 0x1c1   : > { %v1263_v11 = vrot.slane %v1185_v48, 7  ;;  %v1310_v10 = vrot.slane %v1185_v48, 5 }
 0x1c2   : > { %v1111_v13 = vpop.f32.mrf.mxu2 }
 0x1c3   : > { %v1143_v22 = vadd.f32 %v1111_v13, %v1025_v47  ;;  %v1027_v30 = vpop.f32.mrf.mxu1  ;;  %v3035_v8 = vsel %vm353_vm0, %v1262_v59, %v1263_v11  ;;  %v1340_v7 = vsel %vm353_vm0, %v1263_v11, %v1310_v10 }
 0x1c4   : > { %v1505_v3 = vrot.slane %v3035_v8, 2  ;;  %v1395_v18 = vrot.slane %v3035_v8, 1  ;;  %v1397_v42 = vrot.slane %v1340_v7, 1  ;;  %v1028_v21 = vadd.f32 %v1027_v30, %v2830_v63 }
 0x1c5   : > { %v1166_v19 = vadd.f32 %v2867_v56, %v1143_v22  ;;  %v1507_v17 = vrot.slane %v1340_v7, 2 }
 0x1c6   : > { %v1506_v58 = vsel %vm631_vm2, %v1504_v2, %v1505_v3  ;;  %v1396_v52 = vsel %vm498_vm1, %v1394_v35, %v1395_v18  ;;  %v1398_v62 = vsel %vm498_vm1, %v1395_v18, %v1397_v42 }
 0x1c7   : > { %1548 = vrot.lane.b32.xlu2 %v1506_v58, %s2324_s12  ;;  %1440 = vrot.lane.b32.xlu0 %v1398_v62, %s2323_s9  ;;  %v3048_v20 = vmax.f32 %v1166_v19, 0.0  ;;  %v1508_v45 = vsel %vm631_vm2, %v1505_v3, %v1507_v17 }
 0x1c8   : > { %1438 = vrot.lane.b32.xlu1 %v1396_v52, %s2323_s9 }
 0x1c9   : > { %v1221_v37 = vrot.slane %v3048_v20, 1  ;;  %v1265_v59 = vrot.slane %v3048_v20, 7 }
 0x1ca   : > { %v1114_v0 = vpop.f32.mrf.mxu2 }
 0x1cb   : > { %v1144_v16 = vadd.f32 %v1114_v0, %v1028_v21  ;;  %v1030_v61 = vpop.f32.mrf.mxu1  ;;  %v3060_v48 = vsel %vm353_vm0, %v1221_v37, %v1265_v59 }
 0x1cc   : > { %v1031_v11 = vadd.f32 %v1030_v61, %v2836_v51  ;;  %v1399_v22 = vrot.slane %v3060_v48, 1  ;;  %v1509_v3 = vrot.slane %v3060_v48, 2 }
 0x1cd   : > { %v1167_v28 = vadd.f32 %v2867_v56, %v1144_v16 }
 0x1cf   : > { %v3055_v29 = vmax.f32 %v1167_v28, 0.0 }
 0x1d0   : > { %1550 = vrot.lane.b32.xlu1 %v1508_v45, %s2324_s12 }
 0x1d1   : > { %v1266_v63 = vrot.slane %v3055_v29, 7  ;;  %v1311_v1 = vrot.slane %v3055_v29, 5 }
 0x1d2   : > { %v1117_v10 = vpop.f32.mrf.mxu2 }
 0x1d3   : > { %v1145_v47 = vadd.f32 %v1117_v10, %v1031_v11  ;;  %v3066_v13 = vsel %vm353_vm0, %v1265_v59, %v1266_v63  ;;  %v1341_v30 = vsel %vm353_vm0, %v1266_v63, %v1311_v1  ;;  %v1033_v42 = vpop.f32.mrf.mxu1 }
 0x1d4   : > { %v1400_v2 = vrot.slane %v3066_v13, 1  ;;  %v1402_v7 = vrot.slane %v1341_v30, 1  ;;  %v1510_v35 = vrot.slane %v3066_v13, 2  ;;  %v1034_v62 = vadd.f32 %v1033_v42, %v2844_v6  ;;  %v2154_v6 = vld [vmem:[%s3528_s2 + $0x28] sm:$0xff] }
 0x1d5   : > { %v1168_v18 = vadd.f32 %v2867_v56, %v1145_v47  ;;  %v1512_v0 = vrot.slane %v1341_v30, 2  ;;  %2220 = vmatpush.msra.mxu3 %v2154_v6  ;;  %1692 = vmatpush.msra.mxu2 %v2154_v6  ;;  %v1306_v6 = vrot.slane %v2907_v53, 5 }
 0x1d6   : > { %v1401_v51 = vsel %vm498_vm1, %v1399_v22, %v1400_v2  ;;  %v1403_v19 = vsel %vm498_vm1, %v1400_v2, %v1402_v7  ;;  %v1511_v58 = vsel %vm631_vm2, %v1509_v3, %v1510_v35  ;;  %v1214_v3 = vrot.slane %v2903_v40, 1 }
 0x1d7   : > { %1442 = vrot.lane.b32.xlu2 %v1401_v51, %s2323_s9  ;;  %1552 = vrot.lane.b32.xlu0 %v1511_v58, %s2324_s12  ;;  %v1188_v52 = vmax.f32 %v1168_v18, 0.0  ;;  %v1513_v61 = vsel %vm631_vm2, %v1510_v35, %v1512_v0  ;;  %v2153_v51 = vld [vmem:[%s3528_s2 + $0x20] sm:$0xff]  ;;  %v1475_v58 = vrot.slane %v2930_v41, 2 }
 0x1d8   : > { %1444 = vrot.lane.b32.xlu1 %v1403_v19, %s2323_s9  ;;  %v3111_v19 = vsel %vm353_vm0, %v1214_v3, %v1244_v23  ;;  %2221 = vmatpush.msra.mxu3 %v2153_v51 }
 0x1d9   : > { %v1222_v17 = vrot.slane %v1188_v52, 1  ;;  %v1268_v37 = vrot.slane %v1188_v52, 7  ;;  %1693 = vmatpush.msra.mxu2 %v2153_v51  ;;  %v1365_v52 = vrot.slane %v2930_v41, 1  ;;  %v1474_v40 = vrot.slane %v3111_v19, 2 }
 0x1da   : > { %v1120_v21 = vpop.f32.mrf.mxu2  ;;  %v1364_v23 = vrot.slane %v3111_v19, 1 }
 0x1db   : > { %v1146_v16 = vadd.f32 %v1120_v21, %v1034_v62  ;;  %v3085_v45 = vsel %vm353_vm0, %v1222_v17, %v1268_v37  ;;  %v2152_v62 = vld [vmem:[%s3528_s2 + $0x18] sm:$0xff]  ;;  %v1304_v21 = vrot.slane %v2913_v49, 5  ;;  %v1476_v17 = vsel %vm631_vm2, %v1474_v40, %v1475_v58 }
 0x1dc   : > { %v1514_v47 = vrot.slane %v3085_v45, 2  ;;  %v1404_v7 = vrot.slane %v3085_v45, 1  ;;  %2222 = vmatpush.msra.mxu3 %v2152_v62  ;;  %1694 = vmatpush.msra.mxu2 %v2152_v62  ;;  %v1215_v49 = vrot.slane %v1174_v60, 1 }
 0x1dd   : > { %v1169_v59 = vadd.f32 %v2867_v56, %v1146_v16  ;;  %v1216_v16 = vrot.slane %v2897_v39, 1 }
 0x1de   : > { %v3152_v36 = vsel %vm353_vm0, %v1215_v49, %v2880_v26 }
 0x1df   : > { %v1189_v28 = vmax.f32 %v1169_v59, 0.0  ;;  %1554 = vrot.lane.b32.xlu2 %v1513_v61, %s2324_s12  ;;  %v1334_v61 = vsel %vm353_vm0, %v1245_v4, %v1304_v21  ;;  %v1369_v3 = vrot.slane %v3152_v36, 1 }
 0x1e1   : > { %v1269_v63 = vrot.slane %v1189_v28, 7  ;;  %v1312_v1 = vrot.slane %v1189_v28, 5  ;;  %v3134_v28 = vsel %vm353_vm0, %v1216_v16, %v1250_v54  ;;  %v1336_v54 = vsel %vm353_vm0, %v1251_v55, %v1306_v6 }
 0x1e2   : > { %v1377_v60 = vrot.slane %v1336_v54, 1  ;;  %v1484_v53 = vrot.slane %v3134_v28, 2 }
 0x1e3   : > { %v3091_v11 = vsel %vm353_vm0, %v1268_v37, %v1269_v63  ;;  %v1342_v10 = vsel %vm353_vm0, %v1269_v63, %v1312_v1  ;;  %v1366_v37 = vsel %vm498_vm1, %v1364_v23, %v1365_v52  ;;  %v1477_v63 = vrot.slane %v1334_v61, 2 }
 0x1e4   : > { %v1405_v22 = vrot.slane %v3091_v11, 1  ;;  %v1407_v30 = vrot.slane %v1342_v10, 1  ;;  %v1515_v2 = vrot.slane %v3091_v11, 2  ;;  %v1517_v0 = vrot.slane %v1342_v10, 2 }
 0x1e5   : > { %v1375_v1 = vrot.slane %v2923_v15, 1  ;;  %v1367_v10 = vrot.slane %v1334_v61, 1  ;;  %v1478_v4 = vsel %vm631_vm2, %v1475_v58, %v1477_v63  ;;  %v1479_v58 = vrot.slane %v3152_v36, 2 }
 0x1e6   : > { %v1408_v35 = vsel %vm498_vm1, %v1405_v22, %v1407_v30  ;;  %v1516_v18 = vsel %vm631_vm2, %v1514_v47, %v1515_v2  ;;  %v1406_v42 = vsel %vm498_vm1, %v1404_v7, %v1405_v22  ;;  %v1518_v59 = vsel %vm631_vm2, %v1515_v2, %v1517_v0 }
 0x1e7   : > { %1448 = vrot.lane.b32.xlu2 %v1408_v35, %s2323_s9  ;;  %1556 = vrot.lane.b32.xlu1 %v1516_v18, %s2324_s12  ;;  %v1374_v47 = vrot.slane %v3134_v28, 1  ;;  %v1368_v39 = vsel %vm498_vm1, %v1365_v52, %v1367_v10  ;;  %v1370_v30 = vrot.slane %v2890_v32, 1  ;;  %v1305_v2 = vrot.slane %v1175_v25, 5 }
 0x1e8   : > { %1446 = vrot.lane.b32.xlu0 %v1406_v42, %s2323_s9  ;;  %v1485_v7 = vrot.slane %v2923_v15, 2  ;;  %v1378_v55 = vsel %vm498_vm1, %v1375_v1, %v1377_v60  ;;  %v1487_v18 = vrot.slane %v1336_v54, 2  ;;  %v1480_v42 = vrot.slane %v2890_v32, 2 }
 0x1e9   : > { %v1376_v22 = vsel %vm498_vm1, %v1374_v47, %v1375_v1  ;;  %v1371_v35 = vsel %vm498_vm1, %v1369_v3, %v1370_v30  ;;  %v1335_v24 = vsel %vm353_vm0, %v2884_v14, %v1305_v2 }
 0x1ea   : > { %v1486_v26 = vsel %vm631_vm2, %v1484_v53, %v1485_v7  ;;  %v1372_v25 = vrot.slane %v1335_v24, 1  ;;  %v1488_v62 = vsel %vm631_vm2, %v1485_v7, %v1487_v18  ;;  %v1481_v21 = vsel %vm631_vm2, %v1479_v58, %v1480_v42 }
 0x1eb   : > { %v1482_v23 = vrot.slane %v1335_v24, 2 }
 0x1ec   : > { %v1373_v52 = vsel %vm498_vm1, %v1370_v30, %v1372_v25  ;;  %v1626_v25 = vld [vmem:[%s3528_s2 + $0x10] sm:$0xff] }
 0x1ed   : > { %v1483_v61 = vsel %vm631_vm2, %v1480_v42, %v1482_v23  ;;  %1763 = vmatpush.msrb.mxu3 %v1626_v25 }
 0x1ef   : > { %1524 = vrot.lane.b32.xlu2 %v1476_v17, %s2324_s12  ;;  %1414 = vrot.lane.b32.xlu1 %v1366_v37, %s2323_s9  ;;  %v1489_v17 = vrot.slane %v2935_v27, 2  ;;  %v1379_v37 = vrot.slane %v2935_v27, 1 }
 0x1f0   : > { %1558 = vrot.lane.b32.xlu0 %v1518_v59, %s2324_s12 }
 0x1f1   : > { %v1429_v51 = vpop.permute.xlu2 %1428  ;;  %v1491_v59 = vsel %vm631_vm2, %v1489_v17, %v1490_v9  ;;  %v1381_v63 = vsel %vm498_vm1, %v1379_v37, %v1380_v44  ;;  %v1624_v17 = vld [vmem:[%s3528_s2] sm:$0xff]  ;;  %v2187_v37 = vld [vmem:[%s3528_s2 + $0x30] sm:$0xff] }
 0x1f2   : > { %v1591_v14 = vsel %vm764_vm3, %v2942_v34, %v1429_v51 }
 0x1f7   : > { %1526 = vrot.lane.b32.xlu2 %v1478_v4, %s2324_s12  ;;  %1422 = vrot.lane.b32.xlu1 %v1376_v22, %s2323_s9 }
 0x1f8   : > { %1416 = vrot.lane.b32.xlu0 %v1368_v39, %s2323_s9 }
 0x1ff   : > { %1424 = vrot.lane.b32.xlu2 %v1378_v55, %s2323_s9  ;;  %1418 = vrot.lane.b32.xlu1 %v1371_v35, %s2323_s9 }
 0x200   : > { %1532 = vrot.lane.b32.xlu0 %v1486_v26, %s2324_s12 }
 0x201   : > { %v1541_v16 = vpop.permute.xlu2 %1540 }
 0x207   : > { %1420 = vrot.lane.b32.xlu2 %v1373_v52, %s2323_s9  ;;  %1534 = vrot.lane.b32.xlu1 %v1488_v62, %s2324_s12  ;;  %v1625_v62 = vld [vmem:[%s3528_s2 + $0x8] sm:$0xff] }
 0x208   : > { %1528 = vrot.lane.b32.xlu0 %v1481_v21, %s2324_s12  ;;  %v2188_v21 = vld [vmem:[%s3528_s2 + $0x38] sm:$0xff]  ;;  %1764 = vmatpush.msrb.mxu3 %v1625_v62 }
 0x209   : > { %v1539_v0 = vpop.permute.xlu0 %1538  ;;  %v1433_v1 = vpop.permute.xlu2 %1432 }
 0x20a   : > { %v3179_v40 = vsel %vm789_vm5, %v1591_v14, %v1539_v0  ;;  %v1593_v22 = vsel %vm764_vm3, %v2975_v33, %v1433_v1  ;;  %1765 = vmatpush.msrb.mxu3 %v1624_v17 }
 0x20b   : > { %2160 = vmatmul.msk.f32.vlgmr.msra.gmra.mxu3 %vm821_vm4, %v3179_v40 }
 0x20f   : > { %1536 = vrot.lane.b32.xlu2 %v1491_v59, %s2324_s12  ;;  %1530 = vrot.lane.b32.xlu1 %v1483_v61, %s2324_s12 }
 0x210   : > { %1426 = vrot.lane.b32.xlu0 %v1381_v63, %s2323_s9 }
 0x211   : > { %v604_v6 = vpop.permute.xlu0 %603  ;;  %v739_v34 = vpop.permute.xlu2 %738 }
 0x212   : > { %v787_v49 = vsel %vm764_vm3, %v2954_v57, %v604_v6 }
 0x219   : > { %v1543_v4 = vpop.permute.xlu0 %1542  ;;  %v1437_v54 = vpop.permute.xlu2 %1436 }
 0x21a   : > { %v1431_v10 = vpop.permute.xlu1 %1430 }
 0x21b   : > { %v1592_v47 = vsel %vm764_vm3, %v2972_v38, %v1431_v10  ;;  %v3209_v38 = vsel %vm789_vm5, %v1593_v22, %v1543_v4 }
 0x21c   : > { %v3198_v9 = vsel %vm789_vm5, %v1592_v47, %v1541_v16 }
 0x21d   : > { %2161 = vmatmul.msk.f32.gmra.mxu3 %vm821_vm4, %v3198_v9 }
 0x221   : > { %v1549_v53 = vpop.permute.xlu2 %1548 }
 0x222   : > { %v737_v44 = vpop.permute.xlu1 %736 }
 0x223   : > { %v812_v39 = vsel %vm789_vm5, %v787_v49, %v737_v44 }
 0x224   : > { %2150 = vmatmul.msk.f32.gmra.mxu2 %vm821_vm4, %v812_v39 }
 0x225   : > { %2162 = vmatmul.msk.f32.gmra.mxu3 %vm821_vm4, %v3209_v38 }
 0x229   : > { %v1435_v33 = vpop.permute.xlu0 %1434 }
 0x22a   : > { %v606_v60 = vpop.permute.xlu1 %605  ;;  %v1594_v2 = vsel %vm764_vm3, %v3003_v43, %v1435_v33 }
 0x22b   : > { %v788_v57 = vsel %vm764_vm3, %v2951_v50, %v606_v60  ;;  %v1595_v50 = vsel %vm764_vm3, %v3006_v31, %v1437_v54 }
 0x22c   : > { %v813_v30 = vsel %vm789_vm5, %v788_v57, %v739_v34 }
 0x22d   : > { %2151 = vmatmul.msk.f32.gmra.mxu2 %vm821_vm4, %v813_v30 }
 0x231   : > { %v1547_v55 = vpop.permute.xlu0 %1546  ;;  %v1443_v26 = vpop.permute.xlu2 %1442 }
 0x232   : > { %v1545_v7 = vpop.permute.xlu1 %1544  ;;  %v3227_v35 = vsel %vm789_vm5, %v1595_v50, %v1547_v55  ;;  %v1598_v23 = vsel %vm764_vm3, %v3060_v48, %v1443_v26 }
 0x233   : > { %v3220_v3 = vsel %vm789_vm5, %v1594_v2, %v1545_v7 }
 0x234   : > { %2163 = vmatmul.msk.f32.gmra.mxu3 %vm821_vm4, %v3220_v3 }
 0x239   : > { %v1555_v31 = vpop.permute.xlu2 %1554  ;;  %v1441_v42 = vpop.permute.xlu0 %1440 }
 0x23a   : > { %v1439_v43 = vpop.permute.xlu1 %1438  ;;  %v1597_v58 = vsel %vm764_vm3, %v3035_v8, %v1441_v42 }
 0x23b   : > { %v1596_v24 = vsel %vm764_vm3, %v3031_v46, %v1439_v43  ;;  %v2189_v46 = vld [vmem:[%s3528_s2 + $0x40] sm:$0xff] }
 0x23c   : > { %2164 = vmatmul.msk.f32.gmra.mxu3 %vm821_vm4, %v3227_v35  ;;  %v3237_v18 = vsel %vm789_vm5, %v1596_v24, %v1549_v53  ;;  %1838 = vmatpush.msrb.mxu0 %v2189_v46 }
 0x23e   : > { %1839 = vmatpush.msrb.mxu0 %v2188_v21  ;;  %v1200_v21 = vstv %s1199_s30 }
 0x23f   : > { %vm1201_vm7 = vcmp.eq.s32.totalorder %v1200_v21, 1  ;;  %v2269_v21 = vld [vmem:[%s2401_s7 + $0x10] sm:$0xff] }
 0x240   : > { %1840 = vmatpush.msrb.mxu0 %v2187_v37 }
 0x241   : > { %v1449_v14 = vpop.permute.xlu2 %1448 }
 0x242   : > { %v1551_v51 = vpop.permute.xlu1 %1550  ;;  %v1601_v4 = vsel %vm764_vm3, %v3091_v11, %v1449_v14 }
 0x243   : > { %v3244_v52 = vsel %vm789_vm5, %v1597_v58, %v1551_v51 }
 0x244   : > { %2165 = vmatmul.msk.f32.gmra.mxu3 %vm821_vm4, %v3237_v18 }
 0x249   : > { %v1553_v8 = vpop.permute.xlu0 %1552  ;;  %v1525_v63 = vpop.permute.xlu2 %1524 }
 0x24a   : > { %v1445_v0 = vpop.permute.xlu1 %1444  ;;  %v3260_v16 = vsel %vm789_vm5, %v1598_v23, %v1553_v8 }
 0x24b   : > { %v1599_v59 = vsel %vm764_vm3, %v3066_v13, %v1445_v0 }
 0x24c   : > { %2166 = vmatmul.msk.f32.gmra.mxu3 %vm821_vm4, %v3244_v52  ;;  %v3273_v1 = vsel %vm789_vm5, %v1599_v59, %v1555_v31 }
 0x251   : > { %v1527_v13 = vpop.permute.xlu2 %1526 }
 0x254   : > { %2167 = vmatmul.msk.f32.gmra.mxu3 %vm821_vm4, %v3260_v16 }
 0x259   : > { %v1557_v48 = vpop.permute.xlu1 %1556 }
 0x25a   : > { %v1447_v61 = vpop.permute.xlu0 %1446 }
 0x25b   : > { %v1600_v6 = vsel %vm764_vm3, %v3085_v45, %v1447_v61  ;;  %v1425_v45 = vpop.permute.xlu2 %1424 }
 0x25c   : > { %2168 = vmatmul.msk.f32.gmra.mxu3 %vm821_vm4, %v3273_v1  ;;  %v3280_v49 = vsel %vm789_vm5, %v1600_v6, %v1557_v48  ;;  %v1589_v2 = vsel %vm764_vm3, %v2923_v15, %v1425_v45 }
 0x261   : > { %v1415_v10 = vpop.permute.xlu1 %1414 }
 0x262   : > { %v1559_v47 = vpop.permute.xlu0 %1558  ;;  %v1584_v39 = vsel %vm764_vm3, %v3111_v19, %v1415_v10 }
 0x263   : > { %v3287_v22 = vsel %vm789_vm5, %v1601_v4, %v1559_v47  ;;  %v1604_v11 = vsel %vm789_vm5, %v1584_v39, %v1525_v63  ;;  %v1421_v19 = vpop.permute.xlu2 %1420 }
 0x264   : > { %2169 = vmatmul.msk.f32.gmra.mxu3 %vm821_vm4, %v3280_v49  ;;  %v1587_v15 = vsel %vm764_vm3, %v2890_v32, %v1421_v19 }
 0x269   : > { %v1423_v34 = vpop.permute.xlu1 %1422 }
 0x26a   : > { %v1417_v44 = vpop.permute.xlu0 %1416  ;;  %v1588_v60 = vsel %vm764_vm3, %v3134_v28, %v1423_v34 }
 0x26b   : > { %v1585_v33 = vsel %vm764_vm3, %v2930_v41, %v1417_v44  ;;  %v1537_v24 = vpop.permute.xlu2 %1536 }
 0x26c   : > { %2170 = vmatmul.msk.f32.gmra.mxu3 %vm821_vm4, %v3287_v22  ;;  %v1605_v26 = vsel %vm789_vm5, %v1585_v33, %v1527_v13 }
 0x271   : > { %v1419_v54 = vpop.permute.xlu1 %1418 }
 0x272   : > { %v1533_v57 = vpop.permute.xlu0 %1532  ;;  %v1586_v28 = vsel %vm764_vm3, %v3152_v36, %v1419_v54 }
 0x273   : > { %v1608_v30 = vsel %vm789_vm5, %v1588_v60, %v1533_v57 }
 0x274   : > { %2171 = vmatmul.msk.f32.vlgmr.msrb.gmra.mxu3 %vm821_vm4, %v1604_v11  ;;  %2190 = vmatmul.msk.f32.vlgmr.msrb.gmra.mxu0 %vm821_vm4, %v1608_v30 }
 0x279   : > { %v1535_v7 = vpop.permute.xlu1 %1534 }
 0x27a   : > { %v1529_v53 = vpop.permute.xlu0 %1528  ;;  %v1609_v55 = vsel %vm789_vm5, %v1589_v2, %v1535_v7 }
 0x27b   : > { %v1606_v50 = vsel %vm789_vm5, %v1586_v28, %v1529_v53  ;;  %v2267_v53 = vld [vmem:[%s2401_s7] sm:$0xff] }
 0x27c   : > { %2155 = vmatmul.msk.f32.vlgmr.msra.gmra.mxu2 %vm821_vm4, %v1606_v50  ;;  %2172 = vmatmul.msk.f32.gmra.mxu3 %vm821_vm4, %v1605_v26 }
 0x27d   : > { %2191 = vmatmul.msk.f32.gmra.mxu0 %vm821_vm4, %v1609_v55 }
 0x281   : > { %v1531_v41 = vpop.permute.xlu1 %1530 }
 0x282   : > { %v1427_v43 = vpop.permute.xlu0 %1426  ;;  %v1607_v36 = vsel %vm789_vm5, %v1587_v15, %v1531_v41 }
 0x283   : > { %v1590_v25 = vsel %vm764_vm3, %v2935_v27, %v1427_v43  ;;  %v1036_v27 = vpop.f32.mrf.mxu1 }
 0x284   : > { %2156 = vmatmul.msk.f32.gmra.mxu2 %vm821_vm4, %v1607_v36  ;;  %2173 = vmatmul.msk.f32.gmra.mxu3 %vm821_vm4, %v1606_v50  ;;  %v1610_v31 = vsel %vm789_vm5, %v1590_v25, %v1537_v24  ;;  %v1037_v51 = vadd.f32 %v1036_v27, %v2838_v5  ;;  %v2268_v24 = vld [vmem:[%s2401_s7 + $0x8] sm:$0xff] }
 0x285   : > { %2192 = vmatmul.msk.f32.gmra.mxu0 %vm821_vm4, %v1610_v31 }
 0x28b   : > { %v1039_v8 = vpop.f32.mrf.mxu1 }
 0x28c   : > { %2157 = vmatmul.msk.f32.gmra.mxu2 %vm821_vm4, %v1608_v30  ;;  %2174 = vmatmul.msk.f32.gmra.mxu3 %vm821_vm4, %v1607_v36  ;;  %v1040_v0 = vadd.f32 %v1039_v8, %v2846_v12 }
 0x28d   : > { %2193 = vmatmul.msk.f32.gmra.mxu0 %vm821_vm4, %v3179_v40 }
 0x28e   : > { %v3330_v32 = vpop.f32.mrf.mxu3 }
 0x294   : > { %2158 = vmatmul.msk.f32.gmra.mxu2 %vm821_vm4, %v1609_v55  ;;  %2175 = vmatmul.msk.f32.gmra.mxu3 %vm821_vm4, %v1608_v30 }
 0x295   : > { %2194 = vmatmul.msk.f32.gmra.mxu0 %vm821_vm4, %v3198_v9 }
 0x29c   : > { %2159 = vmatmul.msk.f32.gmra.mxu2 %vm821_vm4, %v1610_v31  ;;  %2176 = vmatmul.msk.f32.gmra.mxu3 %vm821_vm4, %v1609_v55 }
 0x29d   : > { %2195 = vmatmul.msk.f32.gmra.mxu0 %vm821_vm4, %v3209_v38 }
 0x2a0   : > { %v3336_v42 = vpop.f32.mrf.mxu3 }
 0x2a4   : > { %2177 = vmatmul.msk.f32.gmra.mxu3 %vm821_vm4, %v1610_v31 }
 0x2a5   : > { %2196 = vmatmul.msk.f32.gmra.mxu0 %vm821_vm4, %v3220_v3 }
 0x2a7   : > { %v1123_v58 = vpop.f32.mrf.mxu2 }
 0x2a8   : > { %v1147_v46 = vadd.f32 %v1123_v58, %v1037_v51  ;;  %v3347_v23 = vpop.f32.mrf.mxu3 }
 0x2aa   : > { %v1170_v62 = vadd.f32 %v2867_v56, %v1147_v46 }
 0x2ac   : > { %v1190_v14 = vmax.f32 %v1170_v62, 0.0  ;;  %2178 = vmatmul.msk.f32.gmra.mxu3 %vm821_vm4, %v3179_v40 }
 0x2ad   : > { %2197 = vmatmul.msk.f32.gmra.mxu0 %vm821_vm4, %v3227_v35 }
 0x2ae   : > { %v1202_v5 = vsel %vm1201_vm7, %v3048_v20, %v1190_v14 }
 0x2af   : > { %v1223_v59 = vrot.slane %v1202_v5, 1  ;;  %v1271_v48 = vrot.slane %v1202_v5, 7 }
 0x2b0   : > { %v1126_v17 = vpop.f32.mrf.mxu2 }
 0x2b1   : > { %v1148_v37 = vadd.f32 %v1126_v17, %v1040_v0  ;;  %v3359_v6 = vsel %vm353_vm0, %v1223_v59, %v1271_v48 }
 0x2b3   : > { %v1171_v61 = vadd.f32 %v2867_v56, %v1148_v37 }
 0x2b4   : > { %2179 = vmatmul.msk.f32.gmra.mxu3 %vm821_vm4, %v3198_v9  ;;  %v1519_v9 = vrot.slane %v3359_v6, 2 }
 0x2b5   : > { %v1191_v40 = vmax.f32 %v1171_v61, 0.0  ;;  %2198 = vmatmul.msk.f32.gmra.mxu0 %vm821_vm4, %v3237_v18 }
 0x2b7   : > { %v1203_v63 = vsel %vm1201_vm7, %v3055_v29, %v1191_v40  ;;  %v3356_v12 = vpop.f32.mrf.mxu3  ;;  %v1409_v29 = vrot.slane %v3359_v6, 1 }
 0x2b8   : > { %v1272_v20 = vrot.slane %v1203_v63, 7  ;;  %v1313_v10 = vrot.slane %v1203_v63, 5 }
 0x2ba   : > { %v3362_v47 = vsel %vm353_vm0, %v1271_v48, %v1272_v20  ;;  %v1343_v56 = vsel %vm353_vm0, %v1272_v20, %v1313_v10  ;;  %v2270_v48 = vld [vmem:[%s2401_s7 + $0x18] sm:$0xff] }
 0x2bb   : > { %v1410_v13 = vrot.slane %v3362_v47, 1  ;;  %v1412_v34 = vrot.slane %v1343_v56, 1  ;;  %v1520_v4 = vrot.slane %v3362_v47, 2  ;;  %v1522_v60 = vrot.slane %v1343_v56, 2 }
 0x2bc   : > { %2180 = vmatmul.msk.f32.gmra.mxu3 %vm821_vm4, %v3209_v38 }
 0x2bd   : > { %2199 = vmatmul.msk.f32.gmra.mxu0 %vm821_vm4, %v3244_v52  ;;  %v1413_v44 = vsel %vm498_vm1, %v1410_v13, %v1412_v34  ;;  %v1521_v45 = vsel %vm631_vm2, %v1519_v9, %v1520_v4  ;;  %v1411_v39 = vsel %vm498_vm1, %v1409_v29, %v1410_v13  ;;  %v1523_v38 = vsel %vm631_vm2, %v1520_v4, %v1522_v60  ;;  %v2271_v29 = vld [vmem:[%s2401_s7 + $0x20] sm:$0xff] }
 0x2be   : > { %1452 = vrot.lane.b32.xlu2 %v1413_v44, %s2323_s9  ;;  %1560 = vrot.lane.b32.xlu1 %v1521_v45, %s2324_s12  ;;  %v2272_v45 = vld [vmem:[%s2401_s7 + $0x28] sm:$0xff] }
 0x2bf   : > { %1450 = vrot.lane.b32.xlu0 %v1411_v39, %s2323_s9  ;;  %v3379_v54 = vpop.f32.mrf.mxu3  ;;  %s2066_s9 = sshll.u32 %s3545_s19, 5 }
 0x2c4   : > { %2181 = vmatmul.msk.f32.gmra.mxu3 %vm821_vm4, %v3220_v3 }
 0x2c5   : > { %2200 = vmatmul.msk.f32.gmra.mxu0 %vm821_vm4, %v3260_v16 }
 0x2c7   : > { %1562 = vrot.lane.b32.xlu0 %v1523_v38, %s2324_s12  ;;  %v3387_v57 = vpop.f32.mrf.mxu3  ;;  %s246_s12 = sadd.s32 %s2066_s9, %s2065_s18 }
 0x2c8   : > { %s2067_s11 = sshll.u32 %s246_s12, 3 }
 0x2c9   : > { %s3427_s26 = scalar_lea.vmem %s3531_s5, %s2067_s11 }
 0x2cc   : > { %2182 = vmatmul.msk.f32.gmra.mxu3 %vm821_vm4, %v3227_v35 }
 0x2cd   : > { %2201 = vmatmul.msk.f32.gmra.mxu0 %vm821_vm4, %v3273_v1 }
 0x2cf   : > { %v3393_v30 = vpop.f32.mrf.mxu3 }
 0x2d4   : > { %2183 = vmatmul.msk.f32.gmra.mxu3 %vm821_vm4, %v3237_v18 }
 0x2d5   : > { %2202 = vmatmul.msk.f32.gmra.mxu0 %vm821_vm4, %v3280_v49 }
 0x2d7   : > { %v3399_v3 = vpop.f32.mrf.mxu3 }
 0x2dc   : > { %2184 = vmatmul.msk.f32.gmra.mxu3 %vm821_vm4, %v3244_v52 }
 0x2dd   : > { %2203 = vmatmul.msk.f32.gmra.mxu0 %vm821_vm4, %v3287_v22 }
 0x2df   : > { %v3405_v35 = vpop.f32.mrf.mxu3 }
 0x2e4   : > { %2185 = vmatmul.msk.f32.gmra.mxu3 %vm821_vm4, %v3260_v16  ;;  %v3421_v16 = vld [vmem:[%s3530_s4] ss:$0 sm:$0xff] }
 0x2e7   : > { %v3409_v11 = vpop.f32.mrf.mxu3 }
 0x2ec   : > { %2186 = vmatmul.msk.f32.gmra.mxu3 %vm821_vm4, %v3273_v1 }
 0x2ef   : > { %v3413_v18 = vpop.f32.mrf.mxu3 }
 0x2f1   : > { %v1842_v49 = vpop.f32.mrf.mxu0 }
 0x2f7   : > { %v1767_v33 = vpop.f32.mrf.mxu3 }
 0x2fa   : > { %v1845_v52 = vpop.f32.mrf.mxu0 }
 0x2ff   : > { %v1696_v22 = vpop.f32.mrf.mxu2  ;;  %v1770_v2 = vpop.f32.mrf.mxu3 }
 0x300   : > { %v1768_v19 = vadd.f32 %v1767_v33, %v1696_v22 }
 0x302   : > { %v1890_v1 = vadd.f32 %v1842_v49, %v1768_v19  ;;  %v1848_v7 = vpop.f32.mrf.mxu0 }
 0x304   : > { %v1909_v28 = vadd.f32 %v3421_v16, %v1890_v1 }
 0x306   : > { %v1925_v55 = vadd.f32 %v2267_v53, %v1909_v28 }
 0x307   : > { %v1699_v50 = vpop.f32.mrf.mxu2  ;;  %v1773_v26 = vpop.f32.mrf.mxu3 }
 0x308   : > { %1941 = vst.msk [vmem:[%s3427_s26] sm:$0xff] %vm764_vm3, %v1925_v55  ;;  %v1771_v15 = vadd.f32 %v1770_v2, %v1699_v50 }
 0x30a   : > { %v1891_v41 = vadd.f32 %v1845_v52, %v1771_v15  ;;  %v1851_v43 = vpop.f32.mrf.mxu0  ;;  %v2273_v52 = vld [vmem:[%s2401_s7 + $0x30] sm:$0xff]  ;;  %v2274_v15 = vld [vmem:[%s2401_s7 + $0x38] sm:$0xff] }
 0x30c   : > { %v1910_v36 = vadd.f32 %v3421_v16, %v1891_v41 }
 0x30e   : > { %v1926_v25 = vadd.f32 %v2268_v24, %v1910_v36 }
 0x30f   : > { %v1702_v31 = vpop.f32.mrf.mxu2  ;;  %v1776_v27 = vpop.f32.mrf.mxu3 }
 0x310   : > { %1942 = vst.msk [vmem:[%s3427_s26 + $0x8] sm:$0xff] %vm764_vm3, %v1926_v25  ;;  %v1774_v51 = vadd.f32 %v1773_v26, %v1702_v31 }
 0x312   : > { %v1892_v58 = vadd.f32 %v1848_v7, %v1774_v51  ;;  %v1854_v46 = vpop.f32.mrf.mxu0  ;;  %v2275_v51 = vld [vmem:[%s2401_s7 + $0x40] sm:$0xff] }
 0x314   : > { %v1911_v62 = vadd.f32 %v3421_v16, %v1892_v58 }
 0x316   : > { %v1927_v8 = vadd.f32 %v2269_v21, %v1911_v62 }
 0x317   : > { %v1705_v14 = vpop.f32.mrf.mxu2  ;;  %v1779_v0 = vpop.f32.mrf.mxu3 }
 0x318   : > { %1943 = vst.msk [vmem:[%s3427_s26 + $0x10] sm:$0xff] %vm764_vm3, %v1927_v8  ;;  %v1777_v5 = vadd.f32 %v1776_v27, %v1705_v14  ;;  %v1453_v26 = vpop.permute.xlu2 %1452  ;;  %v2276_v8 = vld [vmem:[%s2401_s7 + $0x48] sm:$0xff] }
 0x31a   : > { %v1893_v17 = vadd.f32 %v1851_v43, %v1777_v5  ;;  %v1857_v37 = vpop.f32.mrf.mxu0 }
 0x31c   : > { %v1912_v59 = vadd.f32 %v3421_v16, %v1893_v17 }
 0x31e   : > { %v1928_v61 = vadd.f32 %v2270_v48, %v1912_v59  ;;  %v2277_v48 = vld [vmem:[%s2401_s7 + $0x50] sm:$0xff] }
 0x31f   : > { %v1708_v40 = vpop.f32.mrf.mxu2  ;;  %v1782_v63 = vpop.f32.mrf.mxu3 }
 0x320   : > { %1944 = vst.msk [vmem:[%s3427_s26 + $0x18] sm:$0xff] %vm764_vm3, %v1928_v61  ;;  %v1780_v20 = vadd.f32 %v1779_v0, %v1708_v40  ;;  %v1783_v10 = vadd.f32 %v1782_v63, %v3330_v32 }
 0x322   : > { %v1894_v56 = vadd.f32 %v1854_v46, %v1780_v20  ;;  %v1895_v9 = vadd.f32 %v1857_v37, %v1783_v10  ;;  %v1860_v13 = vpop.f32.mrf.mxu0  ;;  %v2278_v10 = vld [vmem:[%s2401_s7 + $0x58] sm:$0xff] }
 0x324   : > { %v1913_v34 = vadd.f32 %v3421_v16, %v1894_v56  ;;  %v1914_v4 = vadd.f32 %v3421_v16, %v1895_v9 }
 0x326   : > { %v1929_v44 = vadd.f32 %v2271_v29, %v1913_v34  ;;  %v1930_v39 = vadd.f32 %v2272_v45, %v1914_v4  ;;  %v2279_v29 = vld [vmem:[%s2401_s7 + $0x60] sm:$0xff] }
 0x327   : > { %v1785_v60 = vpop.f32.mrf.mxu3 }
 0x328   : > { %1945 = vst.msk [vmem:[%s3427_s26 + $0x20] sm:$0xff] %vm764_vm3, %v1929_v44  ;;  %v1786_v38 = vadd.f32 %v1785_v60, %v3336_v42 }
 0x329   : > { %1946 = vst.msk [vmem:[%s3427_s26 + $0x28] sm:$0xff] %vm764_vm3, %v1930_v39 }
 0x32a   : > { %v1896_v32 = vadd.f32 %v1860_v13, %v1786_v38  ;;  %v1863_v49 = vpop.f32.mrf.mxu0 }
 0x32c   : > { %v1915_v33 = vadd.f32 %v3421_v16, %v1896_v32  ;;  %v2280_v32 = vld [vmem:[%s2401_s7 + $0x68] sm:$0xff] }
 0x32e   : > { %v1931_v22 = vadd.f32 %v2273_v52, %v1915_v33 }
 0x32f   : > { %v1788_v2 = vpop.f32.mrf.mxu3 }
 0x330   : > { %1947 = vst.msk [vmem:[%s3427_s26 + $0x30] sm:$0xff] %vm764_vm3, %v1931_v22  ;;  %v1789_v19 = vadd.f32 %v1788_v2, %v3347_v23  ;;  %v1561_v1 = vpop.permute.xlu1 %1560 }
 0x331   : > { %v1451_v7 = vpop.permute.xlu0 %1450 }
 0x332   : > { %v1897_v28 = vadd.f32 %v1863_v49, %v1789_v19  ;;  %v1602_v42 = vsel %vm764_vm3, %v3359_v6, %v1451_v7  ;;  %v1866_v53 = vpop.f32.mrf.mxu0  ;;  %v1603_v6 = vsel %vm764_vm3, %v3362_v47, %v1453_v26 }
 0x333   : > { %v1622_v55 = vsel %vm789_vm5, %v1602_v42, %v1561_v1 }
 0x334   : > { %v1916_v50 = vadd.f32 %v3421_v16, %v1897_v28  ;;  %2204 = vmatmul.msk.f32.gmra.mxu0 %vm821_vm4, %v1622_v55  ;;  %v2282_v55 = vld [vmem:[%s2401_s7 + $0x78] sm:$0xff] }
 0x336   : > { %v1932_v41 = vadd.f32 %v2274_v15, %v1916_v50 }
 0x337   : > { %v1791_v43 = vpop.f32.mrf.mxu3 }
 0x338   : > { %1948 = vst.msk [vmem:[%s3427_s26 + $0x38] sm:$0xff] %vm764_vm3, %v1932_v41  ;;  %v1792_v23 = vadd.f32 %v1791_v43, %v3356_v12 }
 0x339   : > { %v1563_v36 = vpop.permute.xlu0 %1562 }
 0x33a   : > { %v1898_v24 = vadd.f32 %v1866_v53, %v1792_v23  ;;  %v1623_v25 = vsel %vm789_vm5, %v1603_v6, %v1563_v36  ;;  %v1869_v31 = vpop.f32.mrf.mxu0 }
 0x33c   : > { %v1917_v27 = vadd.f32 %v3421_v16, %v1898_v24  ;;  %2205 = vmatmul.msk.f32.gmra.mxu0 %vm821_vm4, %v1623_v25 }
 0x33e   : > { %v1933_v58 = vadd.f32 %v2275_v51, %v1917_v27 }
 0x33f   : > { %v1794_v46 = vpop.f32.mrf.mxu3 }
 0x340   : > { %1949 = vst.msk [vmem:[%s3427_s26 + $0x40] sm:$0xff] %vm764_vm3, %v1933_v58  ;;  %v1795_v12 = vadd.f32 %v1794_v46, %v3379_v54 }
 0x342   : > { %v1899_v47 = vadd.f32 %v1869_v31, %v1795_v12  ;;  %v1872_v62 = vpop.f32.mrf.mxu0 }
 0x344   : > { %v1918_v21 = vadd.f32 %v3421_v16, %v1899_v47 }
 0x346   : > { %v1934_v14 = vadd.f32 %v2276_v8, %v1918_v21 }
 0x347   : > { %v1797_v0 = vpop.f32.mrf.mxu3 }
 0x348   : > { %1950 = vst.msk [vmem:[%s3427_s26 + $0x48] sm:$0xff] %vm764_vm3, %v1934_v14  ;;  %v1798_v5 = vadd.f32 %v1797_v0, %v3387_v57 }
 0x34a   : > { %v1900_v17 = vadd.f32 %v1872_v62, %v1798_v5  ;;  %v1875_v59 = vpop.f32.mrf.mxu0 }
 0x34c   : > { %v1919_v37 = vadd.f32 %v3421_v16, %v1900_v17 }
 0x34e   : > { %v1935_v54 = vadd.f32 %v2277_v48, %v1919_v37 }
 0x34f   : > { %v1800_v61 = vpop.f32.mrf.mxu3 }
 0x350   : > { %1951 = vst.msk [vmem:[%s3427_s26 + $0x50] sm:$0xff] %vm764_vm3, %v1935_v54  ;;  %v1801_v40 = vadd.f32 %v1800_v61, %v3393_v30 }
 0x352   : > { %v1901_v63 = vadd.f32 %v1875_v59, %v1801_v40  ;;  %v1878_v57 = vpop.f32.mrf.mxu0 }
 0x354   : > { %v1920_v20 = vadd.f32 %v3421_v16, %v1901_v63 }
 0x356   : > { %v1936_v56 = vadd.f32 %v2278_v10, %v1920_v20 }
 0x357   : > { %v1803_v9 = vpop.f32.mrf.mxu3 }
 0x358   : > { %1952 = vst.msk [vmem:[%s3427_s26 + $0x58] sm:$0xff] %vm764_vm3, %v1936_v56  ;;  %v1804_v13 = vadd.f32 %v1803_v9, %v3399_v3 }
 0x35a   : > { %v1902_v34 = vadd.f32 %v1878_v57, %v1804_v13  ;;  %v1881_v39 = vpop.f32.mrf.mxu0 }
 0x35c   : > { %v1921_v4 = vadd.f32 %v3421_v16, %v1902_v34 }
 0x35e   : > { %v1937_v44 = vadd.f32 %v2279_v29, %v1921_v4 }
 0x35f   : > { %v1806_v30 = vpop.f32.mrf.mxu3 }
 0x360   : > { %1953 = vst.msk [vmem:[%s3427_s26 + $0x60] sm:$0xff] %vm764_vm3, %v1937_v44  ;;  %v1807_v45 = vadd.f32 %v1806_v30, %v3405_v35  ;;  %v2281_v35 = vld [vmem:[%s2401_s7 + $0x70] sm:$0xff] }
 0x362   : > { %v1903_v60 = vadd.f32 %v1881_v39, %v1807_v45 }
 0x364   : > { %v1922_v38 = vadd.f32 %v3421_v16, %v1903_v60 }
 0x366   : > { %v1938_v49 = vadd.f32 %v2280_v32, %v1922_v38 }
 0x367   : > { %v1809_v3 = vpop.f32.mrf.mxu3 }
 0x368   : > { %1954 = vst.msk [vmem:[%s3427_s26 + $0x68] sm:$0xff] %vm764_vm3, %v1938_v49  ;;  %v1810_v33 = vadd.f32 %v1809_v3, %v3409_v11 }
 0x36f   : > { %v1812_v19 = vpop.f32.mrf.mxu3 }
 0x370   : > { %v1813_v7 = vadd.f32 %v1812_v19, %v3413_v18 }
 0x3b1   : > { %v1884_v52 = vpop.f32.mrf.mxu0 }
 0x3b2   : > { %v1904_v22 = vadd.f32 %v1884_v52, %v1810_v33 }
 0x3b4   : > { %v1923_v2 = vadd.f32 %v3421_v16, %v1904_v22 }
 0x3b6   : > { %v1939_v1 = vadd.f32 %v2281_v35, %v1923_v2 }
 0x3b8   : > { %1955 = vst.msk [vmem:[%s3427_s26 + $0x70] sm:$0xff] %vm764_vm3, %v1939_v1 }
 0x3b9   : > { %v1887_v28 = vpop.f32.mrf.mxu0 }
 0x3ba   : > { %v1905_v42 = vadd.f32 %v1887_v28, %v1813_v7 }
 0x3bc   : > { %v1924_v53 = vadd.f32 %v3421_v16, %v1905_v42 }
 0x3be   : > { %v1940_v50 = vadd.f32 %v2282_v55, %v1924_v53 }
 0x3c0   : > { %1956 = vst.msk [vmem:[%s3427_s26 + $0x78] sm:$0xff] %vm764_vm3, %v1940_v50 }
 0x3c1 PF: > { %s15_s22 = sadd.s32 1, %s2321_s22   ;;  %s3534_s18 = smov %s2313_s20 }
 0x3c2   : > { %p12_p2 = scmp.ge.s32.totalorder %s15_s22, 6   ;;  %s3535_s19 = smov %s2317_s21 }
 0x3c3   : > { %s3536_s20 = smov %s3539_s23  ;;  %s3537_s21 = smov %s3543_s24 }
 0x3c4   :  { %14 = sbr.rel (!%p12_p2) target bundleno = 3 (0x3), region = 79 }

</bundles_post_ra>
